<compile_context>
chip_gen: v7x
topology: tpu7x:2x2x1
jax: 0.10.0
libtpu: 0.0.40
codegen_flags: <defaults>
</compile_context>

<pallas_src>
import functools

import jax
import jax.numpy as jnp
from jax.experimental import pallas as pl
from jax.experimental.pallas import tpu as pltpu


# ----------------------------------------------------------------------------
# Kernel
# ----------------------------------------------------------------------------
def _layer_norm(x, gamma, beta, eps=1e-5):
    mu = jnp.mean(x, axis=-1, keepdims=True)
    var = jnp.mean((x - mu) ** 2, axis=-1, keepdims=True)
    return (x - mu) * jax.lax.rsqrt(var + eps) * gamma + beta


def writer_kernel(n_head,
                  x_ref,                                   # (B, T, C)  embedded input
                  ln1_g, ln1_b, w_qkv, w_proj, b_proj,     # per-layer (layer dim squeezed)
                  ln2_g, ln2_b, w1, b1, w2, b2,
                  lnf_g, lnf_b, w_head, b_head,            # shared final LN + lm_head
                  o_ref,                                   # (B, T, V_pad)  logits out
                  h_ref):                                  # VMEM scratch (B*T, C) f32
    l = pl.program_id(0)
    n_layer = pl.num_programs(0)
    B, T, C = x_ref.shape
    BT = B * T
    hs = C // n_head
    neg_inf = jnp.float32(-1e30)

    # Load the embedded input into the resident activation scratch once.
    @pl.when(l == 0)
    def _():
        h_ref[...] = x_ref[...].astype(jnp.float32).reshape(BT, C)

    x = h_ref[...]                                         # (BT, C) f32 residual stream

    # ---- multi-head causal self-attention on LayerNorm(x) ----
    xn = _layer_norm(x, ln1_g[...], ln1_b[...])
    qkv = jnp.dot(xn.astype(jnp.bfloat16), w_qkv[...],     # fused QKV: (BT, 3C)
                  preferred_element_type=jnp.float32)
    qkv = qkv.reshape(B, T, 3 * C)
    q_all = qkv[:, :, :C].astype(jnp.bfloat16)             # (B, T, C)
    k_all = qkv[:, :, C:2 * C].astype(jnp.bfloat16)
    v_all = qkv[:, :, 2 * C:].astype(jnp.bfloat16)

    row = jax.lax.broadcasted_iota(jnp.int32, (T, T), 0)
    col = jax.lax.broadcasted_iota(jnp.int32, (T, T), 1)
    causal = (col <= row)[None]                            # (1, T, T)

    heads = []
    for h in range(n_head):
        # hs**-0.5 scale is folded into Wq at init, so no score scaling here.
        q = q_all[:, :, h * hs:(h + 1) * hs]                                # (B, T, hs)
        k = k_all[:, :, h * hs:(h + 1) * hs]
        v = v_all[:, :, h * hs:(h + 1) * hs]

        s = jnp.einsum('btd,bsd->bts', q, k,
                       preferred_element_type=jnp.float32)                 # (B, T, T)
        s = jnp.where(causal, s, neg_inf)
        m = jnp.max(s, axis=-1, keepdims=True)
        e = jnp.exp(s - m)
        p = e * pl.reciprocal(jnp.sum(e, axis=-1, keepdims=True), approx=True)

        heads.append(jnp.einsum('bts,bsd->btd', p.astype(jnp.bfloat16), v,
                                preferred_element_type=jnp.float32))       # (B, T, hs)

    attn = jnp.concatenate(heads, axis=-1).reshape(BT, C)                  # (BT, C)
    proj = jnp.dot(attn.astype(jnp.bfloat16), w_proj[...],
                   preferred_element_type=jnp.float32) + b_proj[...]
    x = x + proj                                            # residual

    # ---- feed-forward on LayerNorm(x) ----
    xn2 = _layer_norm(x, ln2_g[...], ln2_b[...])
    h1 = jnp.dot(xn2.astype(jnp.bfloat16), w1[...],
                 preferred_element_type=jnp.float32) + b1[...]
    h1 = jnp.maximum(h1, 0.0)                               # ReLU
    ff = jnp.dot(h1.astype(jnp.bfloat16), w2[...],
                 preferred_element_type=jnp.float32) + b2[...]
    x = x + ff                                              # residual
    h_ref[...] = x                                          # carry to next layer

    # ---- final LayerNorm + lm_head (only after the last layer) ----
    @pl.when(l == n_layer - 1)
    def _():
        xn_f = _layer_norm(x, lnf_g[...], lnf_b[...])
        logits = jnp.dot(xn_f.astype(jnp.bfloat16), w_head[...],
                         preferred_element_type=jnp.float32) + b_head[...]
        o_ref[...] = logits.reshape(B, T, o_ref.shape[-1])


# ----------------------------------------------------------------------------
# Wrapper (single pallas_call for the full stack)
# ----------------------------------------------------------------------------
def _layer_spec(arr):
    """Stacked per-layer param: squeeze the leading layer dim, select layer l."""
    nrest = arr.ndim - 1
    return pl.BlockSpec((None,) + tuple(arr.shape[1:]),
                        lambda l, _n=nrest: (l,) + (0,) * _n)


def _shared_spec(arr):
    """Layer-invariant param: full block, constant index (loaded once)."""
    nd = arr.ndim
    return pl.BlockSpec(tuple(arr.shape), lambda l, _n=nd: (0,) * _n)


def run_writer_stack(x, params, n_head):
    B, T, C = x.shape
    n_layer = params["w_qkv"].shape[0]
    v_pad = params["w_head"].shape[1]

    layer_args = (params["ln1_g"], params["ln1_b"], params["w_qkv"],
                  params["w_proj"], params["b_proj"],
                  params["ln2_g"], params["ln2_b"],
                  params["w1"], params["b1"], params["w2"], params["b2"])
    head_args = (params["lnf_g"], params["lnf_b"],
                 params["w_head"], params["b_head"])

    in_specs = ([pl.BlockSpec((B, T, C), lambda l: (0, 0, 0))]
                + [_layer_spec(a) for a in layer_args]
                + [_shared_spec(a) for a in head_args])

    return pl.pallas_call(
        functools.partial(writer_kernel, n_head),
        out_shape=jax.ShapeDtypeStruct((B, T, v_pad), jnp.float32),
        grid=(n_layer,),
        in_specs=in_specs,
        out_specs=pl.BlockSpec((B, T, v_pad), lambda l: (0, 0, 0)),
        scratch_shapes=[pltpu.VMEM((B * T, C), jnp.float32)],
        compiler_params=pltpu.CompilerParams(
            dimension_semantics=("arbitrary",)),   # layers are sequential (carried state)
    )(x, *layer_args, *head_args)


def writer_forward(idx, params, n_head):
    """Forward pass of Writer (targets=None -> logits only)."""
    B, T = idx.shape
    # Embedding lookup (gather) kept as JAX glue outside the kernel.
    tok = jnp.take(params["tok_emb"], idx, axis=0)           # (B, T, C)
    pos = params["pos_emb"][:T]                              # (T, C)
    x = (tok + pos[None]).astype(jnp.float32)

    logits_pad = run_writer_stack(x, params, n_head)         # (B, T, V_pad)
    # TODO(synk): cross-entropy loss branch (targets is not None) not implemented;
    # this script reproduces the inference path (loss = None).
    return logits_pad[..., :params["vocab_size"]]


# ----------------------------------------------------------------------------
# Pure-JAX reference (same bf16-weight / f32-accumulation math) for validation.
# ----------------------------------------------------------------------------
def writer_forward_ref(idx, params, n_head):
    B, T = idx.shape
    tok = jnp.take(params["tok_emb"], idx, axis=0)
    pos = params["pos_emb"][:T]
    x = (tok + pos[None]).astype(jnp.float32)
    C = x.shape[-1]
    hs = C // n_head
    n_layer = params["w_qkv"].shape[0]
    BT = B * T
    h = x.reshape(BT, C)

    causal = (jnp.arange(T)[None, :] <= jnp.arange(T)[:, None])[None]   # (1, T, T)

    for l in range(n_layer):
        xn = _layer_norm(h, params["ln1_g"][l], params["ln1_b"][l])
        qkv = jnp.dot(xn.astype(jnp.bfloat16), params["w_qkv"][l],
                      preferred_element_type=jnp.float32).reshape(B, T, 3 * C)
        heads = []
        for hd in range(n_head):
            q = qkv[:, :, hd * hs:(hd + 1) * hs].astype(jnp.bfloat16)
            k = qkv[:, :, C + hd * hs:C + (hd + 1) * hs].astype(jnp.bfloat16)
            v = qkv[:, :, 2 * C + hd * hs:2 * C + (hd + 1) * hs].astype(jnp.bfloat16)
            s = jnp.einsum('btd,bsd->bts', q, k, preferred_element_type=jnp.float32)
            s = jnp.where(causal, s, jnp.float32(-1e30))
            p = jax.nn.softmax(s, axis=-1)
            heads.append(jnp.einsum('bts,bsd->btd', p.astype(jnp.bfloat16), v,
                                    preferred_element_type=jnp.float32))
        attn = jnp.concatenate(heads, axis=-1).reshape(BT, C)
        proj = jnp.dot(attn.astype(jnp.bfloat16), params["w_proj"][l],
                       preferred_element_type=jnp.float32) + params["b_proj"][l]
        h = h + proj
        xn2 = _layer_norm(h, params["ln2_g"][l], params["ln2_b"][l])
        h1 = jnp.maximum(jnp.dot(xn2.astype(jnp.bfloat16), params["w1"][l],
                                 preferred_element_type=jnp.float32) + params["b1"][l], 0.0)
        ff = jnp.dot(h1.astype(jnp.bfloat16), params["w2"][l],
                     preferred_element_type=jnp.float32) + params["b2"][l]
        h = h + ff

    xf = _layer_norm(h, params["lnf_g"], params["lnf_b"])
    logits = jnp.dot(xf.astype(jnp.bfloat16), params["w_head"],
                     preferred_element_type=jnp.float32) + params["b_head"]
    return logits.reshape(B, T, -1)[..., :params["vocab_size"]]


# ----------------------------------------------------------------------------
# Deterministic parameter init (matches Writer._init_weights: normal(0, 0.02)
# for Linear/Embedding weights, zero bias, LayerNorm gamma=1 / beta=0).
# Weight matrices are stored (in_features, out_features) and cast to bf16 for
# MXU inputs; biases / LN params stay f32.
# ----------------------------------------------------------------------------
def init_params(key, vocab_size, n_embed, n_layer, n_head, block_size):
    std = 0.02
    hs = n_embed // n_head
    scale = hs ** -0.5
    v_pad = ((vocab_size + 127) // 128) * 128
    keys = iter(jax.random.split(key, 2 + n_layer * 6 + 1))

    def lin_w(in_f, out_f):
        return std * jax.random.normal(next(keys), (in_f, out_f), jnp.float32)

    ones_c = jnp.ones((1, n_embed), jnp.float32)
    zeros_c = jnp.zeros((1, n_embed), jnp.float32)

    params = {
        "vocab_size": vocab_size,
        "tok_emb": std * jax.random.normal(next(keys), (vocab_size, n_embed), jnp.float32),
        "pos_emb": std * jax.random.normal(next(keys), (block_size, n_embed), jnp.float32),
    }

    ln1_g, ln1_b, w_qkv, w_proj, b_proj = [], [], [], [], []
    ln2_g, ln2_b, w1, b1, w2, b2 = [], [], [], [], [], []
    for _ in range(n_layer):
        wq = lin_w(n_embed, n_embed) * scale   # fold 1/sqrt(hs) into Wq
        wk = lin_w(n_embed, n_embed)
        wv = lin_w(n_embed, n_embed)
        ln1_g.append(ones_c);  ln1_b.append(zeros_c)
        w_qkv.append(jnp.concatenate([wq, wk, wv], axis=1))      # (C, 3C)
        w_proj.append(lin_w(n_embed, n_embed))
        b_proj.append(zeros_c)
        ln2_g.append(ones_c);  ln2_b.append(zeros_c)
        w1.append(lin_w(n_embed, 4 * n_embed))
        b1.append(jnp.zeros((1, 4 * n_embed), jnp.float32))
        w2.append(lin_w(4 * n_embed, n_embed))
        b2.append(zeros_c)

    params.update(
        ln1_g=jnp.stack(ln1_g), ln1_b=jnp.stack(ln1_b),
        w_qkv=jnp.stack(w_qkv).astype(jnp.bfloat16),
        w_proj=jnp.stack(w_proj).astype(jnp.bfloat16),
        b_proj=jnp.stack(b_proj),
        ln2_g=jnp.stack(ln2_g), ln2_b=jnp.stack(ln2_b),
        w1=jnp.stack(w1).astype(jnp.bfloat16), b1=jnp.stack(b1),
        w2=jnp.stack(w2).astype(jnp.bfloat16), b2=jnp.stack(b2),
    )

    wh = lin_w(n_embed, vocab_size)
    wh_pad = jnp.zeros((n_embed, v_pad), jnp.float32).at[:, :vocab_size].set(wh)
    params.update(
        lnf_g=ones_c, lnf_b=zeros_c,
        w_head=wh_pad.astype(jnp.bfloat16),
        b_head=jnp.zeros((1, v_pad), jnp.float32),
    )
    return params


# ----------------------------------------------------------------------------
if __name__ == "__main__":
    vocab_size, n_embed, n_layer, n_head, block_size = 65, 32, 2, 4, 8
    B, T = 2, 8

    key = jax.random.PRNGKey(0)
    pkey, ikey = jax.random.split(key)
    params = init_params(pkey, vocab_size, n_embed, n_layer, n_head, block_size)
    idx = jax.random.randint(ikey, (B, T), 0, vocab_size, dtype=jnp.int32)

    logits = writer_forward(idx, params, n_head)
    logits = jax.block_until_ready(logits)

    assert logits.shape == (B, T, vocab_size), logits.shape
    assert bool(jnp.all(jnp.isfinite(logits)))

    ref = jax.block_until_ready(writer_forward_ref(idx, params, n_head))
    assert bool(jnp.allclose(logits, ref, atol=2e-2, rtol=2e-2)), (
        float(jnp.max(jnp.abs(logits - ref))))

    print("KERNEL_OK")
</pallas_src>

<mosaic_0001>
module attributes {stable_mosaic.version = 11 : i64} {
  func.func @writer_kernel(%arg0: i32, %arg1: memref<2x8x32xf32, #tpu.memory_space<vmem>>, %arg2: memref<1x1x32xf32, #tpu.memory_space<vmem>>, %arg3: memref<1x1x32xf32, #tpu.memory_space<vmem>>, %arg4: memref<1x32x96xbf16, #tpu.memory_space<vmem>>, %arg5: memref<1x32x32xbf16, #tpu.memory_space<vmem>>, %arg6: memref<1x1x32xf32, #tpu.memory_space<vmem>>, %arg7: memref<1x1x32xf32, #tpu.memory_space<vmem>>, %arg8: memref<1x1x32xf32, #tpu.memory_space<vmem>>, %arg9: memref<1x32x128xbf16, #tpu.memory_space<vmem>>, %arg10: memref<1x1x128xf32, #tpu.memory_space<vmem>>, %arg11: memref<1x128x32xbf16, #tpu.memory_space<vmem>>, %arg12: memref<1x1x32xf32, #tpu.memory_space<vmem>>, %arg13: memref<1x32xf32, #tpu.memory_space<vmem>>, %arg14: memref<1x32xf32, #tpu.memory_space<vmem>>, %arg15: memref<32x128xbf16, #tpu.memory_space<vmem>>, %arg16: memref<1x128xf32, #tpu.memory_space<vmem>>, %arg17: memref<2x8x128xf32, #tpu.memory_space<vmem>>, %arg18: memref<16x32xf32, #tpu.memory_space<vmem>>) attributes {dimension_semantics = [#tpu.dimension_semantics<arbitrary>], iteration_bounds = array<i64: 2>, scalar_prefetch = 0 : i64, scratch_operands = 1 : i64, tpu.core_type = #tpu.core_type<tc>, window_params = [{pipeline_mode = #tpu.pipeline_mode<synchronous>, transform_indices = @transform_0, window_bounds = array<i64: 2, 8, 32>}, {transform_indices = @transform_1, window_bounds = array<i64: 1, 1, 32>}, {transform_indices = @transform_2, window_bounds = array<i64: 1, 1, 32>}, {transform_indices = @transform_3, window_bounds = array<i64: 1, 32, 96>}, {transform_indices = @transform_4, window_bounds = array<i64: 1, 32, 32>}, {transform_indices = @transform_5, window_bounds = array<i64: 1, 1, 32>}, {transform_indices = @transform_6, window_bounds = array<i64: 1, 1, 32>}, {transform_indices = @transform_7, window_bounds = array<i64: 1, 1, 32>}, {transform_indices = @transform_8, window_bounds = array<i64: 1, 32, 128>}, {transform_indices = @transform_9, window_bounds = array<i64: 1, 1, 128>}, {transform_indices = @transform_10, window_bounds = array<i64: 1, 128, 32>}, {transform_indices = @transform_11, window_bounds = array<i64: 1, 1, 32>}, {pipeline_mode = #tpu.pipeline_mode<synchronous>, transform_indices = @transform_12, window_bounds = array<i64: 1, 32>}, {pipeline_mode = #tpu.pipeline_mode<synchronous>, transform_indices = @transform_13, window_bounds = array<i64: 1, 32>}, {pipeline_mode = #tpu.pipeline_mode<synchronous>, transform_indices = @transform_14, window_bounds = array<i64: 32, 128>}, {pipeline_mode = #tpu.pipeline_mode<synchronous>, transform_indices = @transform_15, window_bounds = array<i64: 1, 128>}, {pipeline_mode = #tpu.pipeline_mode<synchronous>, transform_indices = @transform_16, window_bounds = array<i64: 2, 8, 128>}]} {
    %c0_i32 = arith.constant 0 : i32
    %0 = arith.cmpi eq, %arg0, %c0_i32 : i32
    %1 = arith.extui %0 : i1 to i32
    %c0_i32_0 = arith.constant 0 : i32
    %2 = arith.cmpi ne, %1, %c0_i32_0 : i32
    scf.if %2 {
      %c0_72 = arith.constant 0 : index
      %c0_73 = arith.constant 0 : index
      %c0_74 = arith.constant 0 : index
      %185 = vector.load %arg1[%c0_72, %c0_73, %c0_74] : memref<2x8x32xf32, #tpu.memory_space<vmem>>, vector<2x8x32xf32>
      %186 = vector.shape_cast %185 : vector<2x8x32xf32> to vector<16x32xf32>
      %c0_75 = arith.constant 0 : index
      %c0_76 = arith.constant 0 : index
      %187 = vector.load %arg18[%c0_75, %c0_76] : memref<16x32xf32, #tpu.memory_space<vmem>>, vector<16x32xf32>
      tpu.vector_store %arg18[%c0_75, %c0_76], %186 {strides = array<i32>} : memref<16x32xf32, #tpu.memory_space<vmem>>, vector<16x32xf32>,
    } else {
    }
    %c0 = arith.constant 0 : index
    %c0_1 = arith.constant 0 : index
    %3 = vector.load %arg18[%c0, %c0_1] : memref<16x32xf32, #tpu.memory_space<vmem>>, vector<16x32xf32>
    %c0_2 = arith.constant 0 : index
    %c0_3 = arith.constant 0 : index
    %c0_4 = arith.constant 0 : index
    %4 = vector.load %arg2[%c0_2, %c0_3, %c0_4] : memref<1x1x32xf32, #tpu.memory_space<vmem>>, vector<1x1x32xf32>
    %5 = vector.shape_cast %4 : vector<1x1x32xf32> to vector<1x32xf32>
    %c0_5 = arith.constant 0 : index
    %c0_6 = arith.constant 0 : index
    %c0_7 = arith.constant 0 : index
    %6 = vector.load %arg3[%c0_5, %c0_6, %c0_7] : memref<1x1x32xf32, #tpu.memory_space<vmem>>, vector<1x1x32xf32>
    %7 = vector.shape_cast %6 : vector<1x1x32xf32> to vector<1x32xf32>
    %cst = arith.constant dense<0.000000e+00> : vector<16xf32>
    %8 = vector.multi_reduction <add>, %3, %cst [1] : vector<16x32xf32> to vector<16xf32>
    %9 = vector.shape_cast %8 : vector<16xf32> to vector<16x1xf32>
    %cst_8 = arith.constant 3.200000e+01 : f32
    %10 = vector.broadcast %cst_8 : f32 to vector<16x1xf32>
    %11 = arith.divf %9, %10 : vector<16x1xf32>
    %12 = vector.broadcast %11 : vector<16x1xf32> to vector<16x32xf32>
    %13 = arith.subf %3, %12 : vector<16x32xf32>
    %14 = arith.mulf %13, %13 : vector<16x32xf32>
    %cst_9 = arith.constant dense<0.000000e+00> : vector<16xf32>
    %15 = vector.multi_reduction <add>, %14, %cst_9 [1] : vector<16x32xf32> to vector<16xf32>
    %16 = vector.shape_cast %15 : vector<16xf32> to vector<16x1xf32>
    %cst_10 = arith.constant 3.200000e+01 : f32
    %17 = vector.broadcast %cst_10 : f32 to vector<16x1xf32>
    %18 = arith.divf %16, %17 : vector<16x1xf32>
    %19 = vector.broadcast %11 : vector<16x1xf32> to vector<16x32xf32>
    %20 = arith.subf %3, %19 : vector<16x32xf32>
    %cst_11 = arith.constant 9.99999974E-6 : f32
    %21 = vector.broadcast %cst_11 : f32 to vector<16x1xf32>
    %22 = arith.addf %18, %21 : vector<16x1xf32>
    %23 = math.rsqrt %22 : vector<16x1xf32>
    %24 = vector.broadcast %23 : vector<16x1xf32> to vector<16x32xf32>
    %25 = arith.mulf %20, %24 : vector<16x32xf32>
    %26 = vector.broadcast %5 : vector<1x32xf32> to vector<16x32xf32>
    %27 = arith.mulf %25, %26 : vector<16x32xf32>
    %28 = vector.broadcast %7 : vector<1x32xf32> to vector<16x32xf32>
    %29 = arith.addf %27, %28 : vector<16x32xf32>
    %30 = arith.truncf %29 : vector<16x32xf32> to vector<16x32xbf16>
    %c0_12 = arith.constant 0 : index
    %c0_13 = arith.constant 0 : index
    %c0_14 = arith.constant 0 : index
    %31 = vector.load %arg4[%c0_12, %c0_13, %c0_14] : memref<1x32x96xbf16, #tpu.memory_space<vmem>>, vector<1x32x96xbf16>
    %32 = vector.shape_cast %31 : vector<1x32x96xbf16> to vector<32x96xbf16>
    %cst_15 = arith.constant dense<0.000000e+00> : vector<16x96xf32>
    %33 = tpu.matmul %30, %32, %cst_15 {dimension_numbers = #tpu.dot_dimension_numbers<[1], [0], [0], [1], [0, 0, 1, 1], [], []>} : vector<16x32xbf16>, vector<32x96xbf16>, vector<16x96xf32> -> vector<16x96xf32>
    %34 = vector.shape_cast %33 : vector<16x96xf32> to vector<2x8x96xf32>
    %35 = vector.extract_strided_slice %34 {offsets = [0, 0, 0], sizes = [2, 8, 32], strides = [1, 1, 1]} : vector<2x8x96xf32> to vector<2x8x32xf32>
    %36 = arith.truncf %35 : vector<2x8x32xf32> to vector<2x8x32xbf16>
    %37 = vector.extract_strided_slice %34 {offsets = [0, 0, 32], sizes = [2, 8, 32], strides = [1, 1, 1]} : vector<2x8x96xf32> to vector<2x8x32xf32>
    %38 = arith.truncf %37 : vector<2x8x32xf32> to vector<2x8x32xbf16>
    %39 = vector.extract_strided_slice %34 {offsets = [0, 0, 64], sizes = [2, 8, 32], strides = [1, 1, 1]} : vector<2x8x96xf32> to vector<2x8x32xf32>
    %40 = arith.truncf %39 : vector<2x8x32xf32> to vector<2x8x32xbf16>
    %41 = tpu.iota {dimensions = array<i32: 0>} : vector<8x8xi32>
    %42 = tpu.iota {dimensions = array<i32: 1>} : vector<8x8xi32>
    %43 = arith.cmpi sle, %42, %41 : vector<8x8xi32>
    %44 = vector.shape_cast %43 : vector<8x8xi1> to vector<1x8x8xi1>
    %45 = vector.extract_strided_slice %36 {offsets = [0, 0, 0], sizes = [2, 8, 8], strides = [1, 1, 1]} : vector<2x8x32xbf16> to vector<2x8x8xbf16>
    %46 = vector.extract_strided_slice %38 {offsets = [0, 0, 0], sizes = [2, 8, 8], strides = [1, 1, 1]} : vector<2x8x32xbf16> to vector<2x8x8xbf16>
    %47 = vector.extract_strided_slice %40 {offsets = [0, 0, 0], sizes = [2, 8, 8], strides = [1, 1, 1]} : vector<2x8x32xbf16> to vector<2x8x8xbf16>
    "tpu.trace_start"() <{level = 10 : i32, message = "btd,bsd->bts"}> : () -> ()
    %cst_16 = arith.constant dense<0.000000e+00> : vector<2x8x8xf32>
    %48 = tpu.matmul %45, %46, %cst_16 {dimension_numbers = #tpu.dot_dimension_numbers<[2], [2], [1], [1], [0, 0, 0, 1, 1, 1], [0], [0]>} : vector<2x8x8xbf16>, vector<2x8x8xbf16>, vector<2x8x8xf32> -> vector<2x8x8xf32>
    %cst_17 = arith.constant -1.000000e+30 : f32
    "tpu.trace_stop"() : () -> ()
    %49 = vector.shape_cast %44 : vector<1x8x8xi1> to vector<1x8x8xi1>
    %50 = vector.broadcast %49 : vector<1x8x8xi1> to vector<2x8x8xi1>
    %51 = vector.broadcast %cst_17 : f32 to vector<2x8x8xf32>
    %52 = arith.select %50, %48, %51 : vector<2x8x8xi1>, vector<2x8x8xf32>
    %cst_18 = arith.constant dense<0xFF800000> : vector<2x8xf32>
    %53 = vector.multi_reduction <maximumf>, %52, %cst_18 [2] : vector<2x8x8xf32> to vector<2x8xf32>
    %54 = vector.shape_cast %53 : vector<2x8xf32> to vector<2x8x1xf32>
    %55 = vector.broadcast %54 : vector<2x8x1xf32> to vector<2x8x8xf32>
    %56 = arith.subf %52, %55 : vector<2x8x8xf32>
    %57 = math.exp %56 : vector<2x8x8xf32>
    %cst_19 = arith.constant dense<0.000000e+00> : vector<2x8xf32>
    %58 = vector.multi_reduction <add>, %57, %cst_19 [2] : vector<2x8x8xf32> to vector<2x8xf32>
    %59 = vector.shape_cast %58 : vector<2x8xf32> to vector<2x8x1xf32>
    %60 = tpu.reciprocal %59 {approx = true} : vector<2x8x1xf32> -> vector<2x8x1xf32>
    %61 = vector.broadcast %60 : vector<2x8x1xf32> to vector<2x8x8xf32>
    %62 = arith.mulf %57, %61 : vector<2x8x8xf32>
    %63 = arith.truncf %62 : vector<2x8x8xf32> to vector<2x8x8xbf16>
    "tpu.trace_start"() <{level = 10 : i32, message = "bts,bsd->btd"}> : () -> ()
    %cst_20 = arith.constant dense<0.000000e+00> : vector<2x8x8xf32>
    %64 = tpu.matmul %63, %47, %cst_20 {dimension_numbers = #tpu.dot_dimension_numbers<[2], [1], [1], [2], [0, 0, 0, 1, 1, 2], [0], [0]>} : vector<2x8x8xbf16>, vector<2x8x8xbf16>, vector<2x8x8xf32> -> vector<2x8x8xf32>
    "tpu.trace_stop"() : () -> ()
    %65 = vector.extract_strided_slice %36 {offsets = [0, 0, 8], sizes = [2, 8, 8], strides = [1, 1, 1]} : vector<2x8x32xbf16> to vector<2x8x8xbf16>
    %66 = vector.extract_strided_slice %38 {offsets = [0, 0, 8], sizes = [2, 8, 8], strides = [1, 1, 1]} : vector<2x8x32xbf16> to vector<2x8x8xbf16>
    %67 = vector.extract_strided_slice %40 {offsets = [0, 0, 8], sizes = [2, 8, 8], strides = [1, 1, 1]} : vector<2x8x32xbf16> to vector<2x8x8xbf16>
    "tpu.trace_start"() <{level = 10 : i32, message = "btd,bsd->bts"}> : () -> ()
    %cst_21 = arith.constant dense<0.000000e+00> : vector<2x8x8xf32>
    %68 = tpu.matmul %65, %66, %cst_21 {dimension_numbers = #tpu.dot_dimension_numbers<[2], [2], [1], [1], [0, 0, 0, 1, 1, 1], [0], [0]>} : vector<2x8x8xbf16>, vector<2x8x8xbf16>, vector<2x8x8xf32> -> vector<2x8x8xf32>
    %cst_22 = arith.constant -1.000000e+30 : f32
    "tpu.trace_stop"() : () -> ()
    %69 = vector.shape_cast %44 : vector<1x8x8xi1> to vector<1x8x8xi1>
    %70 = vector.broadcast %69 : vector<1x8x8xi1> to vector<2x8x8xi1>
    %71 = vector.broadcast %cst_22 : f32 to vector<2x8x8xf32>
    %72 = arith.select %70, %68, %71 : vector<2x8x8xi1>, vector<2x8x8xf32>
    %cst_23 = arith.constant dense<0xFF800000> : vector<2x8xf32>
    %73 = vector.multi_reduction <maximumf>, %72, %cst_23 [2] : vector<2x8x8xf32> to vector<2x8xf32>
    %74 = vector.shape_cast %73 : vector<2x8xf32> to vector<2x8x1xf32>
    %75 = vector.broadcast %74 : vector<2x8x1xf32> to vector<2x8x8xf32>
    %76 = arith.subf %72, %75 : vector<2x8x8xf32>
    %77 = math.exp %76 : vector<2x8x8xf32>
    %cst_24 = arith.constant dense<0.000000e+00> : vector<2x8xf32>
    %78 = vector.multi_reduction <add>, %77, %cst_24 [2] : vector<2x8x8xf32> to vector<2x8xf32>
    %79 = vector.shape_cast %78 : vector<2x8xf32> to vector<2x8x1xf32>
    %80 = tpu.reciprocal %79 {approx = true} : vector<2x8x1xf32> -> vector<2x8x1xf32>
    %81 = vector.broadcast %80 : vector<2x8x1xf32> to vector<2x8x8xf32>
    %82 = arith.mulf %77, %81 : vector<2x8x8xf32>
    %83 = arith.truncf %82 : vector<2x8x8xf32> to vector<2x8x8xbf16>
    "tpu.trace_start"() <{level = 10 : i32, message = "bts,bsd->btd"}> : () -> ()
    %cst_25 = arith.constant dense<0.000000e+00> : vector<2x8x8xf32>
    %84 = tpu.matmul %83, %67, %cst_25 {dimension_numbers = #tpu.dot_dimension_numbers<[2], [1], [1], [2], [0, 0, 0, 1, 1, 2], [0], [0]>} : vector<2x8x8xbf16>, vector<2x8x8xbf16>, vector<2x8x8xf32> -> vector<2x8x8xf32>
    "tpu.trace_stop"() : () -> ()
    %85 = vector.extract_strided_slice %36 {offsets = [0, 0, 16], sizes = [2, 8, 8], strides = [1, 1, 1]} : vector<2x8x32xbf16> to vector<2x8x8xbf16>
    %86 = vector.extract_strided_slice %38 {offsets = [0, 0, 16], sizes = [2, 8, 8], strides = [1, 1, 1]} : vector<2x8x32xbf16> to vector<2x8x8xbf16>
    %87 = vector.extract_strided_slice %40 {offsets = [0, 0, 16], sizes = [2, 8, 8], strides = [1, 1, 1]} : vector<2x8x32xbf16> to vector<2x8x8xbf16>
    "tpu.trace_start"() <{level = 10 : i32, message = "btd,bsd->bts"}> : () -> ()
    %cst_26 = arith.constant dense<0.000000e+00> : vector<2x8x8xf32>
    %88 = tpu.matmul %85, %86, %cst_26 {dimension_numbers = #tpu.dot_dimension_numbers<[2], [2], [1], [1], [0, 0, 0, 1, 1, 1], [0], [0]>} : vector<2x8x8xbf16>, vector<2x8x8xbf16>, vector<2x8x8xf32> -> vector<2x8x8xf32>
    %cst_27 = arith.constant -1.000000e+30 : f32
    "tpu.trace_stop"() : () -> ()
    %89 = vector.shape_cast %44 : vector<1x8x8xi1> to vector<1x8x8xi1>
    %90 = vector.broadcast %89 : vector<1x8x8xi1> to vector<2x8x8xi1>
    %91 = vector.broadcast %cst_27 : f32 to vector<2x8x8xf32>
    %92 = arith.select %90, %88, %91 : vector<2x8x8xi1>, vector<2x8x8xf32>
    %cst_28 = arith.constant dense<0xFF800000> : vector<2x8xf32>
    %93 = vector.multi_reduction <maximumf>, %92, %cst_28 [2] : vector<2x8x8xf32> to vector<2x8xf32>
    %94 = vector.shape_cast %93 : vector<2x8xf32> to vector<2x8x1xf32>
    %95 = vector.broadcast %94 : vector<2x8x1xf32> to vector<2x8x8xf32>
    %96 = arith.subf %92, %95 : vector<2x8x8xf32>
    %97 = math.exp %96 : vector<2x8x8xf32>
    %cst_29 = arith.constant dense<0.000000e+00> : vector<2x8xf32>
    %98 = vector.multi_reduction <add>, %97, %cst_29 [2] : vector<2x8x8xf32> to vector<2x8xf32>
    %99 = vector.shape_cast %98 : vector<2x8xf32> to vector<2x8x1xf32>
    %100 = tpu.reciprocal %99 {approx = true} : vector<2x8x1xf32> -> vector<2x8x1xf32>
    %101 = vector.broadcast %100 : vector<2x8x1xf32> to vector<2x8x8xf32>
    %102 = arith.mulf %97, %101 : vector<2x8x8xf32>
    %103 = arith.truncf %102 : vector<2x8x8xf32> to vector<2x8x8xbf16>
    "tpu.trace_start"() <{level = 10 : i32, message = "bts,bsd->btd"}> : () -> ()
    %cst_30 = arith.constant dense<0.000000e+00> : vector<2x8x8xf32>
    %104 = tpu.matmul %103, %87, %cst_30 {dimension_numbers = #tpu.dot_dimension_numbers<[2], [1], [1], [2], [0, 0, 0, 1, 1, 2], [0], [0]>} : vector<2x8x8xbf16>, vector<2x8x8xbf16>, vector<2x8x8xf32> -> vector<2x8x8xf32>
    "tpu.trace_stop"() : () -> ()
    %105 = vector.extract_strided_slice %36 {offsets = [0, 0, 24], sizes = [2, 8, 8], strides = [1, 1, 1]} : vector<2x8x32xbf16> to vector<2x8x8xbf16>
    %106 = vector.extract_strided_slice %38 {offsets = [0, 0, 24], sizes = [2, 8, 8], strides = [1, 1, 1]} : vector<2x8x32xbf16> to vector<2x8x8xbf16>
    %107 = vector.extract_strided_slice %40 {offsets = [0, 0, 24], sizes = [2, 8, 8], strides = [1, 1, 1]} : vector<2x8x32xbf16> to vector<2x8x8xbf16>
    "tpu.trace_start"() <{level = 10 : i32, message = "btd,bsd->bts"}> : () -> ()
    %cst_31 = arith.constant dense<0.000000e+00> : vector<2x8x8xf32>
    %108 = tpu.matmul %105, %106, %cst_31 {dimension_numbers = #tpu.dot_dimension_numbers<[2], [2], [1], [1], [0, 0, 0, 1, 1, 1], [0], [0]>} : vector<2x8x8xbf16>, vector<2x8x8xbf16>, vector<2x8x8xf32> -> vector<2x8x8xf32>
    %cst_32 = arith.constant -1.000000e+30 : f32
    "tpu.trace_stop"() : () -> ()
    %109 = vector.shape_cast %44 : vector<1x8x8xi1> to vector<1x8x8xi1>
    %110 = vector.broadcast %109 : vector<1x8x8xi1> to vector<2x8x8xi1>
    %111 = vector.broadcast %cst_32 : f32 to vector<2x8x8xf32>
    %112 = arith.select %110, %108, %111 : vector<2x8x8xi1>, vector<2x8x8xf32>
    %cst_33 = arith.constant dense<0xFF800000> : vector<2x8xf32>
    %113 = vector.multi_reduction <maximumf>, %112, %cst_33 [2] : vector<2x8x8xf32> to vector<2x8xf32>
    %114 = vector.shape_cast %113 : vector<2x8xf32> to vector<2x8x1xf32>
    %115 = vector.broadcast %114 : vector<2x8x1xf32> to vector<2x8x8xf32>
    %116 = arith.subf %112, %115 : vector<2x8x8xf32>
    %117 = math.exp %116 : vector<2x8x8xf32>
    %cst_34 = arith.constant dense<0.000000e+00> : vector<2x8xf32>
    %118 = vector.multi_reduction <add>, %117, %cst_34 [2] : vector<2x8x8xf32> to vector<2x8xf32>
    %119 = vector.shape_cast %118 : vector<2x8xf32> to vector<2x8x1xf32>
    %120 = tpu.reciprocal %119 {approx = true} : vector<2x8x1xf32> -> vector<2x8x1xf32>
    %121 = vector.broadcast %120 : vector<2x8x1xf32> to vector<2x8x8xf32>
    %122 = arith.mulf %117, %121 : vector<2x8x8xf32>
    %123 = arith.truncf %122 : vector<2x8x8xf32> to vector<2x8x8xbf16>
    "tpu.trace_start"() <{level = 10 : i32, message = "bts,bsd->btd"}> : () -> ()
    %cst_35 = arith.constant dense<0.000000e+00> : vector<2x8x8xf32>
    %124 = tpu.matmul %123, %107, %cst_35 {dimension_numbers = #tpu.dot_dimension_numbers<[2], [1], [1], [2], [0, 0, 0, 1, 1, 2], [0], [0]>} : vector<2x8x8xbf16>, vector<2x8x8xbf16>, vector<2x8x8xf32> -> vector<2x8x8xf32>
    "tpu.trace_stop"() : () -> ()
    %125 = tpu.concatenate %64, %84, %104, %124 in 2 : vector<2x8x8xf32>, vector<2x8x8xf32>, vector<2x8x8xf32>, vector<2x8x8xf32> -> vector<2x8x32xf32>
    %126 = vector.shape_cast %125 : vector<2x8x32xf32> to vector<16x32xf32>
    %127 = arith.truncf %126 : vector<16x32xf32> to vector<16x32xbf16>
    %c0_36 = arith.constant 0 : index
    %c0_37 = arith.constant 0 : index
    %c0_38 = arith.constant 0 : index
    %128 = vector.load %arg5[%c0_36, %c0_37, %c0_38] : memref<1x32x32xbf16, #tpu.memory_space<vmem>>, vector<1x32x32xbf16>
    %129 = vector.shape_cast %128 : vector<1x32x32xbf16> to vector<32x32xbf16>
    %cst_39 = arith.constant dense<0.000000e+00> : vector<16x32xf32>
    %130 = tpu.matmul %127, %129, %cst_39 {dimension_numbers = #tpu.dot_dimension_numbers<[1], [0], [0], [1], [0, 0, 1, 1], [], []>} : vector<16x32xbf16>, vector<32x32xbf16>, vector<16x32xf32> -> vector<16x32xf32>
    %c0_40 = arith.constant 0 : index
    %c0_41 = arith.constant 0 : index
    %c0_42 = arith.constant 0 : index
    %131 = vector.load %arg6[%c0_40, %c0_41, %c0_42] : memref<1x1x32xf32, #tpu.memory_space<vmem>>, vector<1x1x32xf32>
    %132 = vector.shape_cast %131 : vector<1x1x32xf32> to vector<1x32xf32>
    %133 = vector.broadcast %132 : vector<1x32xf32> to vector<16x32xf32>
    %134 = arith.addf %130, %133 : vector<16x32xf32>
    %135 = arith.addf %3, %134 : vector<16x32xf32>
    %c0_43 = arith.constant 0 : index
    %c0_44 = arith.constant 0 : index
    %c0_45 = arith.constant 0 : index
    %136 = vector.load %arg7[%c0_43, %c0_44, %c0_45] : memref<1x1x32xf32, #tpu.memory_space<vmem>>, vector<1x1x32xf32>
    %137 = vector.shape_cast %136 : vector<1x1x32xf32> to vector<1x32xf32>
    %c0_46 = arith.constant 0 : index
    %c0_47 = arith.constant 0 : index
    %c0_48 = arith.constant 0 : index
    %138 = vector.load %arg8[%c0_46, %c0_47, %c0_48] : memref<1x1x32xf32, #tpu.memory_space<vmem>>, vector<1x1x32xf32>
    %139 = vector.shape_cast %138 : vector<1x1x32xf32> to vector<1x32xf32>
    %cst_49 = arith.constant dense<0.000000e+00> : vector<16xf32>
    %140 = vector.multi_reduction <add>, %135, %cst_49 [1] : vector<16x32xf32> to vector<16xf32>
    %141 = vector.shape_cast %140 : vector<16xf32> to vector<16x1xf32>
    %cst_50 = arith.constant 3.200000e+01 : f32
    %142 = vector.broadcast %cst_50 : f32 to vector<16x1xf32>
    %143 = arith.divf %141, %142 : vector<16x1xf32>
    %144 = vector.broadcast %143 : vector<16x1xf32> to vector<16x32xf32>
    %145 = arith.subf %135, %144 : vector<16x32xf32>
    %146 = arith.mulf %145, %145 : vector<16x32xf32>
    %cst_51 = arith.constant dense<0.000000e+00> : vector<16xf32>
    %147 = vector.multi_reduction <add>, %146, %cst_51 [1] : vector<16x32xf32> to vector<16xf32>
    %148 = vector.shape_cast %147 : vector<16xf32> to vector<16x1xf32>
    %cst_52 = arith.constant 3.200000e+01 : f32
    %149 = vector.broadcast %cst_52 : f32 to vector<16x1xf32>
    %150 = arith.divf %148, %149 : vector<16x1xf32>
    %151 = vector.broadcast %143 : vector<16x1xf32> to vector<16x32xf32>
    %152 = arith.subf %135, %151 : vector<16x32xf32>
    %cst_53 = arith.constant 9.99999974E-6 : f32
    %153 = vector.broadcast %cst_53 : f32 to vector<16x1xf32>
    %154 = arith.addf %150, %153 : vector<16x1xf32>
    %155 = math.rsqrt %154 : vector<16x1xf32>
    %156 = vector.broadcast %155 : vector<16x1xf32> to vector<16x32xf32>
    %157 = arith.mulf %152, %156 : vector<16x32xf32>
    %158 = vector.broadcast %137 : vector<1x32xf32> to vector<16x32xf32>
    %159 = arith.mulf %157, %158 : vector<16x32xf32>
    %160 = vector.broadcast %139 : vector<1x32xf32> to vector<16x32xf32>
    %161 = arith.addf %159, %160 : vector<16x32xf32>
    %162 = arith.truncf %161 : vector<16x32xf32> to vector<16x32xbf16>
    %c0_54 = arith.constant 0 : index
    %c0_55 = arith.constant 0 : index
    %c0_56 = arith.constant 0 : index
    %163 = vector.load %arg9[%c0_54, %c0_55, %c0_56] : memref<1x32x128xbf16, #tpu.memory_space<vmem>>, vector<1x32x128xbf16>
    %164 = vector.shape_cast %163 : vector<1x32x128xbf16> to vector<32x128xbf16>
    %cst_57 = arith.constant dense<0.000000e+00> : vector<16x128xf32>
    %165 = tpu.matmul %162, %164, %cst_57 {dimension_numbers = #tpu.dot_dimension_numbers<[1], [0], [0], [1], [0, 0, 1, 1], [], []>} : vector<16x32xbf16>, vector<32x128xbf16>, vector<16x128xf32> -> vector<16x128xf32>
    %c0_58 = arith.constant 0 : index
    %c0_59 = arith.constant 0 : index
    %c0_60 = arith.constant 0 : index
    %166 = vector.load %arg10[%c0_58, %c0_59, %c0_60] : memref<1x1x128xf32, #tpu.memory_space<vmem>>, vector<1x1x128xf32>
    %167 = vector.shape_cast %166 : vector<1x1x128xf32> to vector<1x128xf32>
    %168 = vector.broadcast %167 : vector<1x128xf32> to vector<16x128xf32>
    %169 = arith.addf %165, %168 : vector<16x128xf32>
    %cst_61 = arith.constant 0.000000e+00 : f32
    %170 = vector.broadcast %cst_61 : f32 to vector<16x128xf32>
    %171 = arith.maximumf %169, %170 : vector<16x128xf32>
    %172 = arith.truncf %171 : vector<16x128xf32> to vector<16x128xbf16>
    %c0_62 = arith.constant 0 : index
    %c0_63 = arith.constant 0 : index
    %c0_64 = arith.constant 0 : index
    %173 = vector.load %arg11[%c0_62, %c0_63, %c0_64] : memref<1x128x32xbf16, #tpu.memory_space<vmem>>, vector<1x128x32xbf16>
    %174 = vector.shape_cast %173 : vector<1x128x32xbf16> to vector<128x32xbf16>
    %cst_65 = arith.constant dense<0.000000e+00> : vector<16x32xf32>
    %175 = tpu.matmul %172, %174, %cst_65 {dimension_numbers = #tpu.dot_dimension_numbers<[1], [0], [0], [1], [0, 0, 1, 1], [], []>} : vector<16x128xbf16>, vector<128x32xbf16>, vector<16x32xf32> -> vector<16x32xf32>
    %c0_66 = arith.constant 0 : index
    %c0_67 = arith.constant 0 : index
    %c0_68 = arith.constant 0 : index
    %176 = vector.load %arg12[%c0_66, %c0_67, %c0_68] : memref<1x1x32xf32, #tpu.memory_space<vmem>>, vector<1x1x32xf32>
    %177 = vector.shape_cast %176 : vector<1x1x32xf32> to vector<1x32xf32>
    %178 = vector.broadcast %177 : vector<1x32xf32> to vector<16x32xf32>
    %179 = arith.addf %175, %178 : vector<16x32xf32>
    %180 = arith.addf %135, %179 : vector<16x32xf32>
    %c0_69 = arith.constant 0 : index
    %c0_70 = arith.constant 0 : index
    %181 = vector.load %arg18[%c0_69, %c0_70] : memref<16x32xf32, #tpu.memory_space<vmem>>, vector<16x32xf32>
    tpu.vector_store %arg18[%c0_69, %c0_70], %180 {strides = array<i32>} : memref<16x32xf32, #tpu.memory_space<vmem>>, vector<16x32xf32>,
    %c1_i32 = arith.constant 1 : i32
    %182 = arith.cmpi eq, %arg0, %c1_i32 : i32
    %183 = arith.extui %182 : i1 to i32
    %c0_i32_71 = arith.constant 0 : i32
    %184 = arith.cmpi ne, %183, %c0_i32_71 : i32
    scf.if %184 {
      %c0_72 = arith.constant 0 : index
      %c0_73 = arith.constant 0 : index
      %185 = vector.load %arg13[%c0_72, %c0_73] : memref<1x32xf32, #tpu.memory_space<vmem>>, vector<1x32xf32>
      %c0_74 = arith.constant 0 : index
      %c0_75 = arith.constant 0 : index
      %186 = vector.load %arg14[%c0_74, %c0_75] : memref<1x32xf32, #tpu.memory_space<vmem>>, vector<1x32xf32>
      %cst_76 = arith.constant dense<0.000000e+00> : vector<16xf32>
      %187 = vector.multi_reduction <add>, %180, %cst_76 [1] : vector<16x32xf32> to vector<16xf32>
      %188 = vector.shape_cast %187 : vector<16xf32> to vector<16x1xf32>
      %cst_77 = arith.constant 3.200000e+01 : f32
      %189 = vector.broadcast %cst_77 : f32 to vector<16x1xf32>
      %190 = arith.divf %188, %189 : vector<16x1xf32>
      %191 = vector.broadcast %190 : vector<16x1xf32> to vector<16x32xf32>
      %192 = arith.subf %180, %191 : vector<16x32xf32>
      %193 = arith.mulf %192, %192 : vector<16x32xf32>
      %cst_78 = arith.constant dense<0.000000e+00> : vector<16xf32>
      %194 = vector.multi_reduction <add>, %193, %cst_78 [1] : vector<16x32xf32> to vector<16xf32>
      %195 = vector.shape_cast %194 : vector<16xf32> to vector<16x1xf32>
      %cst_79 = arith.constant 3.200000e+01 : f32
      %196 = vector.broadcast %cst_79 : f32 to vector<16x1xf32>
      %197 = arith.divf %195, %196 : vector<16x1xf32>
      %198 = vector.broadcast %190 : vector<16x1xf32> to vector<16x32xf32>
      %199 = arith.subf %180, %198 : vector<16x32xf32>
      %cst_80 = arith.constant 9.99999974E-6 : f32
      %200 = vector.broadcast %cst_80 : f32 to vector<16x1xf32>
      %201 = arith.addf %197, %200 : vector<16x1xf32>
      %202 = math.rsqrt %201 : vector<16x1xf32>
      %203 = vector.broadcast %202 : vector<16x1xf32> to vector<16x32xf32>
      %204 = arith.mulf %199, %203 : vector<16x32xf32>
      %205 = vector.broadcast %185 : vector<1x32xf32> to vector<16x32xf32>
      %206 = arith.mulf %204, %205 : vector<16x32xf32>
      %207 = vector.broadcast %186 : vector<1x32xf32> to vector<16x32xf32>
      %208 = arith.addf %206, %207 : vector<16x32xf32>
      %209 = arith.truncf %208 : vector<16x32xf32> to vector<16x32xbf16>
      %c0_81 = arith.constant 0 : index
      %c0_82 = arith.constant 0 : index
      %210 = vector.load %arg15[%c0_81, %c0_82] : memref<32x128xbf16, #tpu.memory_space<vmem>>, vector<32x128xbf16>
      %cst_83 = arith.constant dense<0.000000e+00> : vector<16x128xf32>
      %211 = tpu.matmul %209, %210, %cst_83 {dimension_numbers = #tpu.dot_dimension_numbers<[1], [0], [0], [1], [0, 0, 1, 1], [], []>} : vector<16x32xbf16>, vector<32x128xbf16>, vector<16x128xf32> -> vector<16x128xf32>
      %c0_84 = arith.constant 0 : index
      %c0_85 = arith.constant 0 : index
      %212 = vector.load %arg16[%c0_84, %c0_85] : memref<1x128xf32, #tpu.memory_space<vmem>>, vector<1x128xf32>
      %213 = vector.broadcast %212 : vector<1x128xf32> to vector<16x128xf32>
      %214 = arith.addf %211, %213 : vector<16x128xf32>
      %215 = vector.shape_cast %214 : vector<16x128xf32> to vector<2x8x128xf32>
      %c0_86 = arith.constant 0 : index
      %c0_87 = arith.constant 0 : index
      %c0_88 = arith.constant 0 : index
      %216 = vector.load %arg17[%c0_86, %c0_87, %c0_88] : memref<2x8x128xf32, #tpu.memory_space<vmem>>, vector<2x8x128xf32>
      tpu.vector_store %arg17[%c0_86, %c0_87, %c0_88], %215 {strides = array<i32>} : memref<2x8x128xf32, #tpu.memory_space<vmem>>, vector<2x8x128xf32>,
    } else {
    }
    return
  }
  func.func @transform_0(%arg0: i32) -> (i32, i32, i32) {
    %c0_i32 = arith.constant 0 : i32
    %c0_i32_0 = arith.constant 0 : i32
    %c0_i32_1 = arith.constant 0 : i32
    %c0_i32_2 = arith.constant 0 : i32
    return %c0_i32, %c0_i32_0, %c0_i32_1 : i32, i32, i32
  }
  func.func @transform_1(%arg0: i32) -> (i32, i32, i32) {
    %c0_i32 = arith.constant 0 : i32
    %c0_i32_0 = arith.constant 0 : i32
    %c0_i32_1 = arith.constant 0 : i32
    return %arg0, %c0_i32, %c0_i32_0 : i32, i32, i32
  }
  func.func @transform_2(%arg0: i32) -> (i32, i32, i32) {
    %c0_i32 = arith.constant 0 : i32
    %c0_i32_0 = arith.constant 0 : i32
    %c0_i32_1 = arith.constant 0 : i32
    return %arg0, %c0_i32, %c0_i32_0 : i32, i32, i32
  }
  func.func @transform_3(%arg0: i32) -> (i32, i32, i32) {
    %c0_i32 = arith.constant 0 : i32
    %c0_i32_0 = arith.constant 0 : i32
    %c0_i32_1 = arith.constant 0 : i32
    return %arg0, %c0_i32, %c0_i32_0 : i32, i32, i32
  }
  func.func @transform_4(%arg0: i32) -> (i32, i32, i32) {
    %c0_i32 = arith.constant 0 : i32
    %c0_i32_0 = arith.constant 0 : i32
    %c0_i32_1 = arith.constant 0 : i32
    return %arg0, %c0_i32, %c0_i32_0 : i32, i32, i32
  }
  func.func @transform_5(%arg0: i32) -> (i32, i32, i32) {
    %c0_i32 = arith.constant 0 : i32
    %c0_i32_0 = arith.constant 0 : i32
    %c0_i32_1 = arith.constant 0 : i32
    return %arg0, %c0_i32, %c0_i32_0 : i32, i32, i32
  }
  func.func @transform_6(%arg0: i32) -> (i32, i32, i32) {
    %c0_i32 = arith.constant 0 : i32
    %c0_i32_0 = arith.constant 0 : i32
    %c0_i32_1 = arith.constant 0 : i32
    return %arg0, %c0_i32, %c0_i32_0 : i32, i32, i32
  }
  func.func @transform_7(%arg0: i32) -> (i32, i32, i32) {
    %c0_i32 = arith.constant 0 : i32
    %c0_i32_0 = arith.constant 0 : i32
    %c0_i32_1 = arith.constant 0 : i32
    return %arg0, %c0_i32, %c0_i32_0 : i32, i32, i32
  }
  func.func @transform_8(%arg0: i32) -> (i32, i32, i32) {
    %c0_i32 = arith.constant 0 : i32
    %c0_i32_0 = arith.constant 0 : i32
    %c0_i32_1 = arith.constant 0 : i32
    return %arg0, %c0_i32, %c0_i32_0 : i32, i32, i32
  }
  func.func @transform_9(%arg0: i32) -> (i32, i32, i32) {
    %c0_i32 = arith.constant 0 : i32
    %c0_i32_0 = arith.constant 0 : i32
    %c0_i32_1 = arith.constant 0 : i32
    return %arg0, %c0_i32, %c0_i32_0 : i32, i32, i32
  }
  func.func @transform_10(%arg0: i32) -> (i32, i32, i32) {
    %c0_i32 = arith.constant 0 : i32
    %c0_i32_0 = arith.constant 0 : i32
    %c0_i32_1 = arith.constant 0 : i32
    return %arg0, %c0_i32, %c0_i32_0 : i32, i32, i32
  }
  func.func @transform_11(%arg0: i32) -> (i32, i32, i32) {
    %c0_i32 = arith.constant 0 : i32
    %c0_i32_0 = arith.constant 0 : i32
    %c0_i32_1 = arith.constant 0 : i32
    return %arg0, %c0_i32, %c0_i32_0 : i32, i32, i32
  }
  func.func @transform_12(%arg0: i32) -> (i32, i32) {
    %c0_i32 = arith.constant 0 : i32
    %c0_i32_0 = arith.constant 0 : i32
    %c0_i32_1 = arith.constant 0 : i32
    return %c0_i32, %c0_i32_0 : i32, i32
  }
  func.func @transform_13(%arg0: i32) -> (i32, i32) {
    %c0_i32 = arith.constant 0 : i32
    %c0_i32_0 = arith.constant 0 : i32
    %c0_i32_1 = arith.constant 0 : i32
    return %c0_i32, %c0_i32_0 : i32, i32
  }
  func.func @transform_14(%arg0: i32) -> (i32, i32) {
    %c0_i32 = arith.constant 0 : i32
    %c0_i32_0 = arith.constant 0 : i32
    %c0_i32_1 = arith.constant 0 : i32
    return %c0_i32, %c0_i32_0 : i32, i32
  }
  func.func @transform_15(%arg0: i32) -> (i32, i32) {
    %c0_i32 = arith.constant 0 : i32
    %c0_i32_0 = arith.constant 0 : i32
    %c0_i32_1 = arith.constant 0 : i32
    return %c0_i32, %c0_i32_0 : i32, i32
  }
  func.func @transform_16(%arg0: i32) -> (i32, i32, i32) {
    %c0_i32 = arith.constant 0 : i32
    %c0_i32_0 = arith.constant 0 : i32
    %c0_i32_1 = arith.constant 0 : i32
    %c0_i32_2 = arith.constant 0 : i32
    return %c0_i32, %c0_i32_0, %c0_i32_1 : i32, i32, i32
  }
}

</mosaic_0001>

<bundles_post_ra>
// kernel: tpu_custom_call.1
= control target key start
LH: loop header
LB: loop body
LE: loop exit
PB: predicated region body
PF: predicated region fallthrough
CT: control target
= control target key end

     0   :  { %s3186_s0 = inlined_call_operand.vmem [shape: f32[2,8,32], index: 0, kind: input, shape index: {}]   ;;  %s3187_s1 = inlined_call_operand.vmem [shape: f32[2,1,32], index: 1, kind: input, shape index: {}]   ;;  %s3188_s2 = inlined_call_operand.vmem [shape: f32[2,1,32], index: 2, kind: input, shape index: {}]   ;;  %s3189_s3 = inlined_call_operand.vmem [shape: bf16[2,32,96], index: 3, kind: input, shape index: {}]   ;;  %s3190_s4 = inlined_call_operand.vmem [shape: bf16[2,32,32], index: 4, kind: input, shape index: {}]   ;;  %s3191_s5 = inlined_call_operand.vmem [shape: f32[2,1,32], index: 5, kind: input, shape index: {}]   ;;  %s3192_s6 = inlined_call_operand.vmem [shape: f32[2,1,32], index: 6, kind: input, shape index: {}]   ;;  %s3193_s7 = inlined_call_operand.vmem [shape: f32[2,1,32], index: 7, kind: input, shape index: {}]   ;;  %s3194_s8 = inlined_call_operand.vmem [shape: bf16[2,32,128], index: 8, kind: input, shape index: {}]   ;;  %s3195_s9 = inlined_call_operand.vmem [shape: f32[2,1,128], index: 9, kind: input, shape index: {}]   ;;  %s3196_s10 = inlined_call_operand.vmem [shape: bf16[2,128,32], index: 10, kind: input, shape index: {}]   ;;  %s3197_s11 = inlined_call_operand.vmem [shape: f32[2,1,32], index: 11, kind: input, shape index: {}]   ;;  %s3198_s12 = inlined_call_operand.vmem [shape: f32[1,32], index: 12, kind: input, shape index: {}]   ;;  %s3199_s13 = inlined_call_operand.vmem [shape: f32[1,32], index: 13, kind: input, shape index: {}]   ;;  %s3200_s14 = inlined_call_operand.vmem [shape: bf16[32,128], index: 14, kind: input, shape index: {}]   ;;  %s3201_s15 = inlined_call_operand.vmem [shape: f32[1,128], index: 15, kind: input, shape index: {}]   ;;  %s3202_s16 = inlined_call_operand.hbm [shape: f32[2,8,128], index: 16, kind: output, shape index: {}]  }
   0x1   :  { %3206 = sst [smem:[#allocation7_spill]] %s3186_s0 }
   0x2   :  { %3207 = sst [smem:[#allocation8_spill]] %s3189_s3 }
   0x3   :  { %3208 = sst [smem:[#allocation9_spill]] %s3190_s4 }
   0x4   :  { %3209 = sst [smem:[#allocation10_spill]] %s3198_s12 }
   0x5   :  { %3210 = sst [smem:[#allocation11_spill]] %s3199_s13 }
   0x6   :  { %3211 = sst [smem:[#allocation12_spill]] %s3201_s15 }
   0x7   :  { %3212 = sst [smem:[#allocation13_spill]] %s3202_s16 }
   0x8   :  { %21 = vsyncpa [#allocation4], 0  ;;  %s2801_s21 = smov 0  }
   0x9 LB: > { %3213 = sst [smem:[#allocation6_spill]] %s2694_s21  ;;  %s2807_s22 = sadd.s32 4294967295, %s2694_s21   ;;  %s2694_s21 = sphi %s2801_s21, %s27_s21  }
   0xa   : > { %p2283_p0 = scmp.ge.s32.totalorder %s2694_s21, 1  ;;  %p544_p1 = scmp.lt.s32.totalorder %s2694_s21, 3 }
   0xc   : > { %p545_p2 = pnand %p2283_p0, %p544_p1 }
   0xd   : > { %p625_p3 = scmp.lt.s32.totalorder (!%p545_p2), %s2807_s22, 1  ;;  %s3214_s3 = sld [smem:[#allocation8_spill]] (!%p545_p2) }
   0xe   : > { %548 = sbr.rel (%p545_p2) target bundleno = 4718 (0x126e), region = 84  ;;  %s3215_s4 = sld [smem:[#allocation9_spill]] (!%p545_p2) }
   0xf   : > { %p2292_p4 = scmp.ne.s32.totalorder (!%p545_p2), %s2807_s22, 0 }
  0x15   : > { %s2813_s23 = scalar_select %p625_p3, %s2807_s22, 1 }
  0x16   : > { %670 = sbr.rel (%p2292_p4) target bundleno = 30 (0x1e), region = 88  ;;  %s3216_s28 = sld [smem:[#allocation7_spill]] (!%p2292_p4)  ;;  %vm673_vm0 = vcmask (!%p2292_p4), 261120  }
  0x17   : > { %s2344_s30 = sshll.u32 %s2813_s23, 4  ;;  %s649_s13 = scalar_lea.vmem %s3193_s7, %s2813_s23 }
  0x18   : > { %s2831_s24 = scalar_lea.vmem %s3214_s3, %s2344_s30  ;;  %s2836_s16 = scalar_lea.vmem %s3215_s4, %s2344_s30 }
  0x19   : > { %s2849_s18 = scalar_lea.vmem %s3194_s8, %s2344_s30  ;;  %s657_s3 = scalar_lea.vmem %s3195_s9, %s2813_s23 }
  0x1a   : > { %s2347_s21 = sshll.u32 %s2813_s23, 6  ;;  %s665_s12 = scalar_lea.vmem %s3197_s11, %s2813_s23 }
  0x1b   : > { %s2863_s27 = scalar_lea.vmem %s3196_s10, %s2347_s21 }
  0x1c   : > { %v671_v0 = vld [vmem:[%s3216_s28] sm:$0xff] (!%p2292_p4)  ;;  %v672_v1 = vld [vmem:[%s3216_s28 + $0x8] sm:$0xff] (!%p2292_p4) }
  0x1d   : > { %674 = vst.msk [vmem:[#allocation2] sm:$0xff] %vm673_vm0, %v671_v0  ;;  %675 = vst.msk [vmem:[#allocation2 + $0x8] sm:$0xff] %vm673_vm0, %v672_v1 }
  0x1e PF: > { %vm680_vm1 = vcmask 261120   ;;  %v2598_v16 = vld [vmem:[%s2831_s24] sm:$0xff]   ;;  %v2696_v17 = vmov 0.0   ;;  %v2599_v18 = vld [vmem:[%s2831_s24 + $0x8] sm:$0xff]   ;;  %vm2697_vm2 = vmmov 0   ;;  %s3217_s19 = scalar_lea.vmem %s3187_s1, %s2813_s23  ;;  %s3218_s25 = scalar_lea.vmem %s3188_s2, %s2813_s23  ;;  %vm795_vm3 = vcmask 64512  }
  0x1f   : > { %2401 = vmatprep.subr.bf16.mxu0 %v2696_v17  ;;  %2421 = vmatprep.subr.bf16.mxu1 %v2696_v17  ;;  %v2293_v27 = vld [vmem:[%s3217_s19] ss:$0 sm:$0xff]  ;;  %s2698_s15 = smov 96   ;;  %v787_v46 = vlaneseq  ;;  %s2699_s26 = smov 64   ;;  %vm924_vm5 = vcmask 1043456   ;;  %vm1708_vm6 = vcmask 130048  }
  0x20   : > { %2402 = vmatpush3.bf16.msra.mxu0 %v2598_v16  ;;  %2405 = vmatprep.mubr.msk.bf16.mxu0 %vm2697_vm2, %v2696_v17  ;;  %v2294_v31 = vld [vmem:[%s3218_s25] ss:$0 sm:$0xff]  ;;  %s2700_s29 = smov 88   ;;  %s2701_s30 = smov 120   ;;  %vm1711_vm7 = vcmask 195584  }
  0x21   : > { %2403 = vmatprep.subr.bf16.mxu0 %v2696_v17  ;;  %2423 = vmatprep.mubr.msk.bf16.mxu1 %vm2697_vm2, %v2696_v17  ;;  %v788_v47 = vshrl.u32 %v787_v46, 7  ;;  %v790_v48 = vand.u32 127, %v787_v46  ;;  %s2702_s0 = smov 56   ;;  %s2703_s17 = smov 80  }
  0x22   : > { %s2704_s4 = smov 112   ;;  %s2705_s24 = smov 48  }
  0x23   : > { %vm2925_vm4 = vcmp.le.s32.totalorder %v790_v48, %v788_v47  ;;  %s2706_s19 = smov 72   ;;  %s2707_s20 = smov 104  }
  0x24   : > { %v2872_v2 = vld [vmem:[#allocation2] sm:$0xff]  ;;  %v2874_v3 = vld [vmem:[#allocation2 + $0x8] sm:$0xff]  ;;  %2404 = vmatpush3.bf16.msra.mxu0 %v2599_v18  ;;  %s2708_s21 = smov 40   ;;  %s2709_s25 = smov 8  }
  0x25   : > { %v681_v4 = vsel %vm680_vm1, %v2872_v2, 0.0  ;;  %v684_v5 = vsel %vm680_vm1, %v2874_v3, 0.0  ;;  %2409 = vmatprep.subr.bf16.mxu0 %v2696_v17  ;;  %p2333_p5 = scmp.ne.s32.totalorder %s2807_s22, 1 }
  0x26   : > { %682 = vadd.xlane.f32.xlu0 %v681_v4  ;;  %vm2713_vm8 = vmmov (!%p2333_p5), 0  }
  0x2a   : > { %685 = vadd.xlane.f32.xlu0 %v684_v5 }
  0xb3   : > { %v683_v6 = vpop.xlane.xlu0 %682 }
  0xb4   : > { %v688_v7 = vmul.f32 0.03125, %v683_v6 }
  0xb6   : > { %v690_v8 = vsub.f32 %v2872_v2, %v688_v7 }
  0xb7   : > { %v686_v9 = vpop.xlane.xlu0 %685 }
  0xb8   : > { %v689_v10 = vmul.f32 0.03125, %v686_v9  ;;  %v692_v11 = vmul.f32 %v690_v8, %v690_v8 }
  0xba   : > { %v691_v12 = vsub.f32 %v2874_v3, %v689_v10  ;;  %v694_v13 = vsel %vm680_vm1, %v692_v11, 0.0 }
  0xbb   : > { %695 = vadd.xlane.f32.xlu1 %v694_v13 }
  0xbc   : > { %v693_v14 = vmul.f32 %v691_v12, %v691_v12 }
  0xbe   : > { %v697_v15 = vsel %vm680_vm1, %v693_v14, 0.0 }
  0xbf   : > { %698 = vadd.xlane.f32.xlu1 %v697_v15 }
 0x148   : > { %v696_v19 = vpop.xlane.xlu1 %695 }
 0x149   : > { %v700_v20 = vmul.f32 0.03125, %v696_v19 }
 0x14b   : > { %v702_v21 = vadd.f32 1e-05, %v700_v20 }
 0x14c   : > { %v699_v22 = vpop.xlane.xlu1 %698 }
 0x14d   : > { %2612 = vrsqrt.f32 %v702_v21  ;;  %v701_v23 = vmul.f32 0.03125, %v699_v22 }
 0x14f   : > { %v703_v24 = vadd.f32 1e-05, %v701_v23 }
 0x151   : > { %2614 = vrsqrt.f32 %v703_v24 }
 0x157   : > { %v2613_v25 = vpop.eup %2612 }
 0x158   : > { %v706_v26 = vmul.f32 %v2613_v25, %v690_v8 }
 0x15a   : > { %v714_v30 = vmul.f32 %v2293_v27, %v706_v26 }
 0x15b   : > { %v2615_v28 = vpop.eup %2614 }
 0x15c   : > { %v707_v29 = vmul.f32 %v2615_v28, %v691_v12  ;;  %v722_v33 = vadd.f32 %v2294_v31, %v714_v30 }
 0x15e   : > { %v715_v32 = vmul.f32 %v2293_v27, %v707_v29 }
 0x160   : > { %v723_v34 = vadd.f32 %v2294_v31, %v715_v32 }
 0x162   : > { %v724_v35 = vpack.c.bf16 %v723_v34, %v722_v33 }
 0x164   : > { %2406 = vmatmul.mubr.msk.bf16.vlgmr.msra.gmra.mrb[0].mxu0 %vm680_vm1, %v724_v35 }
 0x165   : > { %2411 = vmatprep.mubr.msk.bf16.mxu0 %vm2697_vm2, %v2696_v17 }
 0x237   : > { %v778_v36 = vpop.f32.mrb[0].mxu0 }
 0x238   : > { %v2907_v37 = vpack.c.bf16 %v778_v36, %v778_v36  ;;  %v2407_v38 = vpop.f32.mrb[1].mxu0 }
 0x239   : > { %v781_v39 = vpop.f32.mrb[2].mxu0 }
 0x23a   : > { %v2909_v40 = vpack.c.bf16 %v781_v39, %v781_v39  ;;  %793 = vrot.lane.b32.xlu0 %v2907_v37, %s2698_s15  ;;  %v2408_v41 = vpop.f32.mrb[3].mxu0 }
 0x23c   : > { %843 = vrot.lane.b32.xlu1 %v2909_v40, %s2698_s15  ;;  %s2710_s15 = smov 16  }
 0x2ac   : > { %v794_v42 = vpop.permute.xlu0 %793 }
 0x2ad   : > { %v800_v43 = vsel %vm795_vm3, %v794_v42, 0 }
 0x2ae   : > { %2410 = vmatpush3.bf16.xpose.msra.mxu0 %v800_v43  ;;  %v844_v44 = vpop.permute.xlu1 %843 }
 0x2af   : > { %2415 = vmatprep.subr.bf16.mxu0 %v2696_v17  ;;  %v849_v45 = vsel %vm795_vm3, %v844_v44, 0 }
 0x2b5   : > { %2412 = vmatmul.mubr.msk.bf16.vlgmr.msra.gmra.mrb[4].mxu0 %vm795_vm3, %v2907_v37 }
 0x2b6   : > { %2416 = vmatpush3.bf16.xpose.msra.mxu0 %v849_v45  ;;  %2417 = vmatprep.mubr.msk.bf16.mxu0 %vm2697_vm2, %v2696_v17 }
 0x2b7   : > { %2427 = vmatprep.subr.bf16.mxu0 %v2696_v17 }
 0x2bd   : > { %2418 = vmatmul.mubr.msk.bf16.vlgmr.msra.gmra.mrb[8].mxu0 %vm795_vm3, %v2909_v40 }
 0x2be   : > { %2429 = vmatprep.mubr.msk.bf16.mxu0 %vm2697_vm2, %v2696_v17 }
 0x388   : > { %v836_v50 = vpop.f32.mrb[4].mxu0 }
 0x389   : > { %v893_v51 = vsel %vm2925_vm4, %v836_v50, -1e+30  ;;  %v2413_v52 = vpop.f32.mrb[5].mxu0 }
 0x38a   : > { %v839_v53 = vpop.f32.mrb[6].mxu0  ;;  %v895_v54 = vsel %vm795_vm3, %v893_v51, -inf }
 0x38b   : > { %896 = vmax.xlane.f32.xlu1 %v895_v54  ;;  %v2414_v55 = vpop.f32.mrb[7].mxu0 }
 0x390   : > { %v885_v56 = vpop.f32.mrb[8].mxu0 }
 0x391   : > { %v894_v57 = vsel %vm2925_vm4, %v885_v56, -1e+30  ;;  %v2419_v58 = vpop.f32.mrb[9].mxu0 }
 0x392   : > { %v888_v59 = vpop.f32.mrb[10].mxu0  ;;  %v898_v60 = vsel %vm795_vm3, %v894_v57, -inf }
 0x393   : > { %899 = vmax.xlane.f32.xlu0 %v898_v60  ;;  %v2420_v61 = vpop.f32.mrb[11].mxu0 }
 0x39c   : > { %968 = vrot.lane.b32.xlu1 %v2909_v40, %s2699_s26 }
 0x3a0   : > { %1018 = vrot.lane.b32.xlu1 %v2907_v37, %s2700_s29 }
 0x418   : > { %v897_v62 = vpop.xlane.xlu1 %896 }
 0x419   : > { %v901_v63 = vsub.f32 %v893_v51, %v897_v62 }
 0x41b   : > { %v903_v0 = vmul.f32 1.442695, %v901_v63 }
 0x41c   : > { %v969_v1 = vpop.permute.xlu1 %968 }
 0x41d   : > { %2616 = vpow2.f32 %v903_v0  ;;  %v974_v4 = vsel %vm924_vm5, %v969_v1, 0 }
 0x41e   : > { %2428 = vmatpush3.bf16.msra.mxu0 %v974_v4 }
 0x41f   : > { %2439 = vmatprep.subr.bf16.mxu0 %v2696_v17 }
 0x420   : > { %v900_v5 = vpop.xlane.xlu0 %899  ;;  %v1019_v13 = vpop.permute.xlu1 %1018 }
 0x421   : > { %v902_v6 = vsub.f32 %v894_v57, %v900_v5  ;;  %v1024_v21 = vsel %vm795_vm3, %v1019_v13, 0 }
 0x423   : > { %v905_v7 = vmul.f32 1.442695, %v902_v6 }
 0x425   : > { %2618 = vpow2.f32 %v905_v7 }
 0x427   : > { %v2617_v8 = vpop.eup %2616 }
 0x428   : > { %v907_v9 = vsel %vm795_vm3, %v2617_v8, 0.0 }
 0x429   : > { %908 = vadd.xlane.f32.xlu0 %v907_v9 }
 0x42f   : > { %v2619_v10 = vpop.eup %2618 }
 0x430   : > { %v910_v11 = vsel %vm795_vm3, %v2619_v10, 0.0 }
 0x431   : > { %911 = vadd.xlane.f32.xlu1 %v910_v11 }
 0x43f   : > { %919 = vrot.lane.b32.xlu0 %v2907_v37, %s2699_s26  ;;  %s2711_s26 = smov 24  }
 0x442   : > { %1068 = vrot.lane.b32.xlu1 %v2909_v40, %s2700_s29 }
 0x443   : > { %1016 = vrot.lane.b32.xlu0 %v2907_v37, %s2701_s30 }
 0x446   : > { %1066 = vrot.lane.b32.xlu1 %v2909_v40, %s2701_s30  ;;  %s3221_s30 = scalar_lea.vmem %s3191_s5, %s2813_s23 }
 0x4b6   : > { %v909_v12 = vpop.xlane.xlu0 %908 }
 0x4b7   : > { %2620 = vrcp.f32 %v909_v12 }
 0x4ba   : > { %v920_v14 = vpop.permute.xlu0 %919 }
 0x4bb   : > { %v926_v15 = vsel %vm924_vm5, %v920_v14, 0 }
 0x4bc   : > { %2422 = vmatpush3.bf16.msra.mxu1 %v926_v15 }
 0x4bd   : > { %2433 = vmatprep.subr.bf16.mxu1 %v2696_v17 }
 0x4be   : > { %v912_v16 = vpop.xlane.xlu1 %911  ;;  %v1017_v26 = vpop.permute.xlu0 %1016 }
 0x4bf   : > { %2622 = vrcp.f32 %v912_v16 }
 0x4c1   : > { %v2621_v18 = vpop.eup %2620 }
 0x4c2   : > { %v915_v19 = vmul.f32 %v2621_v18, %v2617_v8  ;;  %v1069_v24 = vpop.permute.xlu1 %1068 }
 0x4c3   : > { %v1074_v27 = vsel %vm795_vm3, %v1069_v24, 0 }
 0x4c4   : > { %v917_v20 = vpack.c.bf16 %v915_v19, %v915_v19 }
 0x4c6   : > { %2424 = vmatmul.mubr.msk.bf16.vlgmr.msra.gmra.mrb[0].mxu1 %vm795_vm3, %v917_v20  ;;  %v1067_v28 = vpop.permute.xlu1 %1066 }
 0x4c7   : > { %2434 = vmatpush3.bf16.xpose.msra.mxu1 %v1024_v21  ;;  %2435 = vmatprep.mubr.msk.bf16.mxu1 %vm2697_vm2, %v2696_v17 }
 0x4c8   : > { %2445 = vmatprep.subr.bf16.mxu1 %v2696_v17 }
 0x4c9   : > { %v2623_v22 = vpop.eup %2622 }
 0x4ca   : > { %v916_v23 = vmul.f32 %v2623_v22, %v2619_v10 }
 0x4cc   : > { %v918_v25 = vpack.c.bf16 %v916_v23, %v916_v23 }
 0x4ce   : > { %2430 = vmatmul.mubr.msk.bf16.vlgmr.msra.gmra.mrb[12].mxu0 %vm795_vm3, %v918_v25  ;;  %2436 = vmatmul.mubr.msk.bf16.vlgmr.msra.gmra.mrb[4].mxu1 %vm795_vm3, %v1017_v26 }
 0x4cf   : > { %2440 = vmatpush3.bf16.xpose.msra.mxu0 %v1074_v27  ;;  %2441 = vmatprep.mubr.msk.bf16.mxu0 %vm2697_vm2, %v2696_v17 }
 0x4d0   : > { %2451 = vmatprep.subr.bf16.mxu0 %v2696_v17  ;;  %2447 = vmatprep.mubr.msk.bf16.mxu1 %vm2697_vm2, %v2696_v17 }
 0x4d6   : > { %2442 = vmatmul.mubr.msk.bf16.vlgmr.msra.gmra.mrb[16].mxu0 %vm795_vm3, %v1067_v28 }
 0x4d7   : > { %2453 = vmatprep.mubr.msk.bf16.mxu0 %vm2697_vm2, %v2696_v17 }
 0x599   : > { %v2963_v29 = vpop.f32.mrb[0].mxu1 }
 0x59a   : > { %v2425_v30 = vpop.f32.mrb[1].mxu1 }
 0x59b   : > { %v965_v31 = vpop.f32.mrb[2].mxu1 }
 0x59c   : > { %v2426_v32 = vpop.f32.mrb[3].mxu1 }
 0x5a1   : > { %v2965_v33 = vpop.f32.mrb[12].mxu0  ;;  %v1060_v34 = vpop.f32.mrb[4].mxu1 }
 0x5a2   : > { %v1116_v35 = vsel %vm2925_vm4, %v1060_v34, -1e+30  ;;  %v2431_v36 = vpop.f32.mrb[13].mxu0  ;;  %v2437_v38 = vpop.f32.mrb[5].mxu1 }
 0x5a3   : > { %v1013_v39 = vpop.f32.mrb[14].mxu0  ;;  %v1063_v41 = vpop.f32.mrb[6].mxu1  ;;  %v1118_v42 = vsel %vm795_vm3, %v1116_v35, -inf }
 0x5a4   : > { %1119 = vmax.xlane.f32.xlu0 %v1118_v42  ;;  %v2432_v43 = vpop.f32.mrb[15].mxu0  ;;  %v2438_v44 = vpop.f32.mrb[7].mxu1 }
 0x5a9   : > { %v1110_v45 = vpop.f32.mrb[16].mxu0 }
 0x5aa   : > { %v1117_v46 = vsel %vm2925_vm4, %v1110_v45, -1e+30  ;;  %v2443_v47 = vpop.f32.mrb[17].mxu0 }
 0x5ab   : > { %v1113_v48 = vpop.f32.mrb[18].mxu0  ;;  %v1121_v50 = vsel %vm795_vm3, %v1117_v46, -inf }
 0x5ac   : > { %1122 = vmax.xlane.f32.xlu1 %v1121_v50  ;;  %v2444_v51 = vpop.f32.mrb[19].mxu0 }
 0x5bd   : > { %1190 = vrot.lane.b32.xlu1 %v2909_v40, %s2702_s0 }
 0x5c1   : > { %1240 = vrot.lane.b32.xlu1 %v2907_v37, %s2703_s17 }
 0x5c5   : > { %1290 = vrot.lane.b32.xlu1 %v2909_v40, %s2703_s17  ;;  %s3222_s17 = scalar_lea.vmem %s3192_s6, %s2813_s23 }
 0x5c9   : > { %1288 = vrot.lane.b32.xlu1 %v2909_v40, %s2704_s4 }
 0x631   : > { %v1120_v52 = vpop.xlane.xlu0 %1119 }
 0x632   : > { %v1124_v53 = vsub.f32 %v1116_v35, %v1120_v52 }
 0x634   : > { %v1126_v54 = vmul.f32 1.442695, %v1124_v53 }
 0x636   : > { %2624 = vpow2.f32 %v1126_v54 }
 0x639   : > { %v1123_v55 = vpop.xlane.xlu1 %1122 }
 0x63a   : > { %v1125_v56 = vsub.f32 %v1117_v46, %v1123_v55 }
 0x63c   : > { %v1128_v57 = vmul.f32 1.442695, %v1125_v56 }
 0x63d   : > { %v1191_v58 = vpop.permute.xlu1 %1190 }
 0x63e   : > { %2626 = vpow2.f32 %v1128_v57  ;;  %v1196_v59 = vsel %vm924_vm5, %v1191_v58, 0 }
 0x63f   : > { %2452 = vmatpush3.bf16.msra.mxu0 %v1196_v59 }
 0x640   : > { %v2625_v60 = vpop.eup %2624  ;;  %2463 = vmatprep.subr.bf16.mxu0 %v2696_v17 }
 0x641   : > { %v1130_v61 = vsel %vm795_vm3, %v2625_v60, 0.0  ;;  %v1241_v9 = vpop.permute.xlu1 %1240 }
 0x642   : > { %1131 = vadd.xlane.f32.xlu0 %v1130_v61  ;;  %v1246_v13 = vsel %vm795_vm3, %v1241_v9, 0 }
 0x645   : > { %v1291_v12 = vpop.permute.xlu1 %1290 }
 0x646   : > { %v1296_v15 = vsel %vm795_vm3, %v1291_v12, 0 }
 0x648   : > { %v2627_v62 = vpop.eup %2626 }
 0x649   : > { %v1133_v63 = vsel %vm795_vm3, %v2627_v62, 0.0  ;;  %v1289_v18 = vpop.permute.xlu1 %1288 }
 0x64a   : > { %1134 = vadd.xlane.f32.xlu0 %v1133_v63 }
 0x660   : > { %1142 = vrot.lane.b32.xlu0 %v2907_v37, %s2702_s0 }
 0x664   : > { %1238 = vrot.lane.b32.xlu0 %v2907_v37, %s2704_s4  ;;  %s3225_s4 = sld [smem:[#allocation12_spill]] (!%p2333_p5) }
 0x6cf   : > { %v1132_v0 = vpop.xlane.xlu0 %1131 }
 0x6d0   : > { %2628 = vrcp.f32 %v1132_v0 }
 0x6d7   : > { %v1135_v1 = vpop.xlane.xlu0 %1134 }
 0x6d8   : > { %2630 = vrcp.f32 %v1135_v1 }
 0x6da   : > { %v2629_v4 = vpop.eup %2628 }
 0x6db   : > { %v1138_v5 = vmul.f32 %v2629_v4, %v2625_v60  ;;  %v1143_v6 = vpop.permute.xlu0 %1142 }
 0x6dc   : > { %v1148_v7 = vsel %vm924_vm5, %v1143_v6, 0 }
 0x6dd   : > { %2446 = vmatpush3.bf16.msra.mxu1 %v1148_v7  ;;  %v1140_v8 = vpack.c.bf16 %v1138_v5, %v1138_v5 }
 0x6de   : > { %2457 = vmatprep.subr.bf16.mxu1 %v2696_v17 }
 0x6df   : > { %v1239_v16 = vpop.permute.xlu0 %1238 }
 0x6e0   : > { %2448 = vmatmul.mubr.msk.bf16.vlgmr.msra.gmra.mrb[8].mxu1 %vm795_vm3, %v1140_v8 }
 0x6e1   : > { %2459 = vmatprep.mubr.msk.bf16.mxu1 %vm2697_vm2, %v2696_v17 }
 0x6e2   : > { %v2631_v10 = vpop.eup %2630 }
 0x6e3   : > { %v1139_v11 = vmul.f32 %v2631_v10, %v2627_v62 }
 0x6e5   : > { %v1141_v14 = vpack.c.bf16 %v1139_v11, %v1139_v11 }
 0x6e6   : > { %2458 = vmatpush3.bf16.xpose.msra.mxu1 %v1246_v13 }
 0x6e7   : > { %2454 = vmatmul.mubr.msk.bf16.vlgmr.msra.gmra.mrb[20].mxu0 %vm795_vm3, %v1141_v14  ;;  %2469 = vmatprep.subr.bf16.mxu1 %v2696_v17 }
 0x6e8   : > { %2464 = vmatpush3.bf16.xpose.msra.mxu0 %v1296_v15  ;;  %2465 = vmatprep.mubr.msk.bf16.mxu0 %vm2697_vm2, %v2696_v17 }
 0x6e9   : > { %2475 = vmatprep.subr.bf16.mxu0 %v2696_v17 }
 0x6ed   : > { %2460 = vmatmul.mubr.msk.bf16.vlgmr.msra.gmra.mrb[12].mxu1 %vm795_vm3, %v1239_v16 }
 0x6ee   : > { %2471 = vmatprep.mubr.msk.bf16.mxu1 %vm2697_vm2, %v2696_v17 }
 0x6ef   : > { %2466 = vmatmul.mubr.msk.bf16.vlgmr.msra.gmra.mrb[24].mxu0 %vm795_vm3, %v1289_v18 }
 0x6f0   : > { %2477 = vmatprep.mubr.msk.bf16.mxu0 %vm2697_vm2, %v2696_v17 }
 0x7b3   : > { %v3001_v19 = vpop.f32.mrb[8].mxu1 }
 0x7b4   : > { %v2449_v20 = vpop.f32.mrb[9].mxu1 }
 0x7b5   : > { %v1187_v21 = vpop.f32.mrb[10].mxu1 }
 0x7b6   : > { %v2450_v22 = vpop.f32.mrb[11].mxu1 }
 0x7ba   : > { %v3003_v23 = vpop.f32.mrb[20].mxu0 }
 0x7bb   : > { %v2583_v24 = vpack.i.bf16 %v3003_v23, %v3001_v19  ;;  %v2455_v25 = vpop.f32.mrb[21].mxu0 }
 0x7bc   : > { %v1235_v26 = vpop.f32.mrb[22].mxu0 }
 0x7bd   : > { %v2456_v27 = vpop.f32.mrb[23].mxu0 }
 0x7c0   : > { %v1282_v28 = vpop.f32.mrb[12].mxu1 }
 0x7c1   : > { %v1338_v30 = vsel %vm2925_vm4, %v1282_v28, -1e+30  ;;  %v2461_v31 = vpop.f32.mrb[13].mxu1 }
 0x7c2   : > { %v1285_v32 = vpop.f32.mrb[14].mxu1  ;;  %v1332_v34 = vpop.f32.mrb[24].mxu0  ;;  %v1340_v35 = vsel %vm795_vm3, %v1338_v30, -inf }
 0x7c3   : > { %v1339_v36 = vsel %vm2925_vm4, %v1332_v34, -1e+30  ;;  %1341 = vmax.xlane.f32.xlu0 %v1340_v35  ;;  %v2462_v38 = vpop.f32.mrb[15].mxu1  ;;  %v2467_v39 = vpop.f32.mrb[25].mxu0 }
 0x7c4   : > { %v1335_v41 = vpop.f32.mrb[26].mxu0  ;;  %v1343_v42 = vsel %vm795_vm3, %v1339_v36, -inf }
 0x7c5   : > { %1344 = vmax.xlane.f32.xlu1 %v1343_v42  ;;  %v2468_v43 = vpop.f32.mrb[27].mxu0 }
 0x7d6   : > { %1412 = vrot.lane.b32.xlu1 %v2909_v40, %s2705_s24 }
 0x7da   : > { %1462 = vrot.lane.b32.xlu1 %v2907_v37, %s2706_s19 }
 0x7de   : > { %1512 = vrot.lane.b32.xlu1 %v2909_v40, %s2706_s19 }
 0x7e2   : > { %1510 = vrot.lane.b32.xlu1 %v2909_v40, %s2707_s20 }
 0x850   : > { %v1342_v44 = vpop.xlane.xlu0 %1341 }
 0x851   : > { %v1346_v45 = vsub.f32 %v1338_v30, %v1342_v44 }
 0x852   : > { %v1345_v46 = vpop.xlane.xlu1 %1344 }
 0x853   : > { %v1348_v47 = vmul.f32 1.442695, %v1346_v45  ;;  %v1347_v48 = vsub.f32 %v1339_v36, %v1345_v46 }
 0x855   : > { %2632 = vpow2.f32 %v1348_v47  ;;  %v1350_v50 = vmul.f32 1.442695, %v1347_v48 }
 0x856   : > { %v1413_v51 = vpop.permute.xlu1 %1412 }
 0x857   : > { %2634 = vpow2.f32 %v1350_v50  ;;  %v1418_v52 = vsel %vm924_vm5, %v1413_v51, 0 }
 0x858   : > { %2476 = vmatpush3.bf16.msra.mxu0 %v1418_v52 }
 0x859   : > { %2487 = vmatprep.subr.bf16.mxu0 %v2696_v17 }
 0x85a   : > { %v1463_v62 = vpop.permute.xlu1 %1462 }
 0x85b   : > { %v1468_v6 = vsel %vm795_vm3, %v1463_v62, 0 }
 0x85e   : > { %v1513_v5 = vpop.permute.xlu1 %1512 }
 0x85f   : > { %v2633_v53 = vpop.eup %2632  ;;  %v1518_v8 = vsel %vm795_vm3, %v1513_v5, 0 }
 0x860   : > { %v1352_v54 = vsel %vm795_vm3, %v2633_v53, 0.0 }
 0x861   : > { %v2635_v55 = vpop.eup %2634  ;;  %1353 = vadd.xlane.f32.xlu0 %v1352_v54 }
 0x862   : > { %v1355_v56 = vsel %vm795_vm3, %v2635_v55, 0.0  ;;  %v1511_v10 = vpop.permute.xlu1 %1510 }
 0x865   : > { %1356 = vadd.xlane.f32.xlu0 %v1355_v56 }
 0x87b   : > { %1364 = vrot.lane.b32.xlu0 %v2907_v37, %s2705_s24 }
 0x87f   : > { %1460 = vrot.lane.b32.xlu0 %v2907_v37, %s2707_s20 }
 0x8ee   : > { %v1354_v57 = vpop.xlane.xlu0 %1353 }
 0x8ef   : > { %2636 = vrcp.f32 %v1354_v57  ;;  %v2600_v57 = vld [vmem:[%s2836_s16] sm:$0xff]  }
 0x8f2   : > { %v1357_v58 = vpop.xlane.xlu0 %1356 }
 0x8f3   : > { %2638 = vrcp.f32 %v1357_v58  ;;  %v2601_v58 = vld [vmem:[%s2836_s16 + $0x8] sm:$0xff]   ;;  %s3223_s16 = sld [smem:[#allocation10_spill]] (!%p2333_p5) }
 0x8f6   : > { %v1365_v59 = vpop.permute.xlu0 %1364 }
 0x8f7   : > { %v1370_v60 = vsel %vm924_vm5, %v1365_v59, 0 }
 0x8f8   : > { %2470 = vmatpush3.bf16.msra.mxu1 %v1370_v60 }
 0x8f9   : > { %v2637_v61 = vpop.eup %2636  ;;  %2481 = vmatprep.subr.bf16.mxu1 %v2696_v17 }
 0x8fa   : > { %v1360_v63 = vmul.f32 %v2637_v61, %v2633_v53  ;;  %v1461_v9 = vpop.permute.xlu0 %1460 }
 0x8fc   : > { %v1362_v0 = vpack.c.bf16 %v1360_v63, %v1360_v63 }
 0x8fd   : > { %v2639_v1 = vpop.eup %2638 }
 0x8fe   : > { %v1361_v4 = vmul.f32 %v2639_v1, %v2635_v55  ;;  %2472 = vmatmul.mubr.msk.bf16.vlgmr.msra.gmra.mrb[16].mxu1 %vm795_vm3, %v1362_v0 }
 0x8ff   : > { %2483 = vmatprep.mubr.msk.bf16.mxu1 %vm2697_vm2, %v2696_v17 }
 0x900   : > { %v1363_v7 = vpack.c.bf16 %v1361_v4, %v1361_v4 }
 0x901   : > { %2482 = vmatpush3.bf16.xpose.msra.mxu1 %v1468_v6 }
 0x902   : > { %2478 = vmatmul.mubr.msk.bf16.vlgmr.msra.gmra.mrb[28].mxu0 %vm795_vm3, %v1363_v7  ;;  %2493 = vmatprep.subr.bf16.mxu1 %v2696_v17 }
 0x903   : > { %2488 = vmatpush3.bf16.xpose.msra.mxu0 %v1518_v8  ;;  %2489 = vmatprep.mubr.msk.bf16.mxu0 %vm2697_vm2, %v2696_v17 }
 0x904   : > { %2499 = vmatprep.subr.bf16.mxu0 %v2696_v17 }
 0x908   : > { %2484 = vmatmul.mubr.msk.bf16.vlgmr.msra.gmra.mrb[20].mxu1 %vm795_vm3, %v1461_v9 }
 0x909   : > { %2495 = vmatprep.mubr.msk.bf16.mxu1 %vm2697_vm2, %v2696_v17 }
 0x90a   : > { %2490 = vmatmul.mubr.msk.bf16.vlgmr.msra.gmra.mrb[32].mxu0 %vm795_vm3, %v1511_v10 }
 0x90b   : > { %2501 = vmatprep.mubr.msk.bf16.mxu0 %vm2697_vm2, %v2696_v17 }
 0x9d1   : > { %v1406_v11 = vpop.f32.mrb[16].mxu1 }
 0x9d2   : > { %v2473_v12 = vpop.f32.mrb[17].mxu1 }
 0x9d3   : > { %v1409_v13 = vpop.f32.mrb[18].mxu1 }
 0x9d4   : > { %v2474_v14 = vpop.f32.mrb[19].mxu1 }
 0x9d5   : > { %v1454_v15 = vpop.f32.mrb[28].mxu0 }
 0x9d6   : > { %v2588_v16 = vpack.i.bf16 %v1454_v15, %v1406_v11  ;;  %v2479_v18 = vpop.f32.mrb[29].mxu0 }
 0x9d7   : > { %v1457_v20 = vpop.f32.mrb[30].mxu0 }
 0x9d8   : > { %v2480_v21 = vpop.f32.mrb[31].mxu0 }
 0x9db   : > { %v1504_v22 = vpop.f32.mrb[20].mxu1 }
 0x9dc   : > { %v1560_v25 = vsel %vm2925_vm4, %v1504_v22, -1e+30  ;;  %v2485_v26 = vpop.f32.mrb[21].mxu1 }
 0x9dd   : > { %v1507_v27 = vpop.f32.mrb[22].mxu1  ;;  %v1554_v28 = vpop.f32.mrb[32].mxu0  ;;  %v1562_v30 = vsel %vm795_vm3, %v1560_v25, -inf }
 0x9de   : > { %v1561_v31 = vsel %vm2925_vm4, %v1554_v28, -1e+30  ;;  %1563 = vmax.xlane.f32.xlu0 %v1562_v30  ;;  %v2486_v32 = vpop.f32.mrb[23].mxu1  ;;  %v2491_v34 = vpop.f32.mrb[33].mxu0 }
 0x9df   : > { %v1557_v35 = vpop.f32.mrb[34].mxu0  ;;  %v1565_v36 = vsel %vm795_vm3, %v1561_v31, -inf }
 0x9e0   : > { %1566 = vmax.xlane.f32.xlu1 %v1565_v36  ;;  %v2492_v38 = vpop.f32.mrb[35].mxu0 }
 0x9f1   : > { %1634 = vrot.lane.b32.xlu1 %v2909_v40, %s2708_s21 }
 0x9f5   : > { %2584 = vrot.lane.b32.xlu1 %v2583_v24, %s2709_s25 }
 0x9f9   : > { %2589 = vrot.lane.b32.xlu1 %v2588_v16, %s2710_s15 }
 0xa6b   : > { %v1564_v49 = vpop.xlane.xlu0 %1563 }
 0xa6c   : > { %v1568_v39 = vsub.f32 %v1560_v25, %v1564_v49 }
 0xa6d   : > { %v1567_v41 = vpop.xlane.xlu1 %1566 }
 0xa6e   : > { %v1570_v42 = vmul.f32 1.442695, %v1568_v39  ;;  %v1569_v43 = vsub.f32 %v1561_v31, %v1567_v41 }
 0xa70   : > { %2640 = vpow2.f32 %v1570_v42  ;;  %v1572_v44 = vmul.f32 1.442695, %v1569_v43 }
 0xa71   : > { %v1635_v45 = vpop.permute.xlu1 %1634 }
 0xa72   : > { %2642 = vpow2.f32 %v1572_v44  ;;  %v1640_v46 = vsel %vm924_vm5, %v1635_v45, 0 }
 0xa73   : > { %2500 = vmatpush3.bf16.msra.mxu0 %v1640_v46  ;;  %v2602_v46 = vld [vmem:[%s2849_s18] sm:$0xff]  }
 0xa74   : > { %2513 = vmatprep.subr.bf16.mxu0 %v2696_v17 }
 0xa75   : > { %v2585_v6 = vpop.permute.xlu1 %2584 }
 0xa76   : > { %v2587_v8 = vunpack.i.h.bf16 %v2585_v6  ;;  %v2586_v9 = vunpack.i.l.bf16 %v2585_v6  ;;  %v2611_v6 = vld [vmem:[%s2863_s27 + $0x38] sm:$0xff]  }
 0xa78   : > { %v1707_v13 = vsel %vm795_vm3, %v2965_v33, %v2587_v8  ;;  %v1706_v14 = vsel %vm795_vm3, %v2963_v29, %v2586_v9  ;;  %v2314_v33 = vld [vmem:[%s3221_s30] ss:$0 sm:$0xff] }
 0xa79   : > { %v2590_v7 = vpop.permute.xlu1 %2589 }
 0xa7a   : > { %v2641_v40 = vpop.eup %2640  ;;  %v2592_v10 = vunpack.i.h.bf16 %v2590_v7  ;;  %v2591_v11 = vunpack.i.l.bf16 %v2590_v7  ;;  %v2320_v7 = vld [vmem:[%s657_s3] ss:$0 sm:$0xff] }
 0xa7b   : > { %v1574_v19 = vsel %vm795_vm3, %v2641_v40, 0.0 }
 0xa7c   : > { %v2643_v23 = vpop.eup %2642  ;;  %1575 = vadd.xlane.f32.xlu0 %v1574_v19  ;;  %v1709_v18 = vsel %vm1708_vm6, %v1706_v14, %v2591_v11  ;;  %v1710_v20 = vsel %vm1708_vm6, %v1707_v13, %v2592_v10  ;;  %v2604_v19 = vld [vmem:[%s2863_s27] sm:$0xff]  }
 0xa7d   : > { %v1577_v24 = vsel %vm795_vm3, %v2643_v23, 0.0 }
 0xa80   : > { %1578 = vadd.xlane.f32.xlu0 %v1577_v24  ;;  %v2606_v24 = vld [vmem:[%s2863_s27 + $0x10] sm:$0xff]  }
 0xa96   : > { %1586 = vrot.lane.b32.xlu0 %v2907_v37, %s2708_s21 }
 0xb09   : > { %v1576_v47 = vpop.xlane.xlu0 %1575 }
 0xb0a   : > { %2644 = vrcp.f32 %v1576_v47  ;;  %v2607_v47 = vld [vmem:[%s2863_s27 + $0x18] sm:$0xff]  }
 0xb0d   : > { %v1579_v48 = vpop.xlane.xlu0 %1578 }
 0xb0e   : > { %2646 = vrcp.f32 %v1579_v48  ;;  %v2608_v48 = vld [vmem:[%s2863_s27 + $0x20] sm:$0xff]  }
 0xb11   : > { %v1587_v50 = vpop.permute.xlu0 %1586 }
 0xb12   : > { %v1592_v51 = vsel %vm924_vm5, %v1587_v50, 0  ;;  %v2609_v50 = vld [vmem:[%s2863_s27 + $0x28] sm:$0xff]  }
 0xb13   : > { %2494 = vmatpush3.bf16.msra.mxu1 %v1592_v51 }
 0xb14   : > { %v2645_v52 = vpop.eup %2644  ;;  %2505 = vmatprep.subr.bf16.mxu1 %v2696_v17 }
 0xb15   : > { %v1582_v53 = vmul.f32 %v2645_v52, %v2641_v40  ;;  %v2603_v40 = vld [vmem:[%s2849_s18 + $0x8] sm:$0xff]   ;;  %s3224_s18 = sld [smem:[#allocation11_spill]] (!%p2333_p5) }
 0xb17   : > { %v1584_v54 = vpack.c.bf16 %v1582_v53, %v1582_v53 }
 0xb18   : > { %v2647_v55 = vpop.eup %2646 }
 0xb19   : > { %v1583_v56 = vmul.f32 %v2647_v55, %v2643_v23  ;;  %2496 = vmatmul.mubr.msk.bf16.vlgmr.msra.gmra.mrb[24].mxu1 %vm795_vm3, %v1584_v54  ;;  %v2605_v23 = vld [vmem:[%s2863_s27 + $0x8] sm:$0xff]  }
 0xb1a   : > { %2509 = vmatprep.mubr.msk.bf16.mxu1 %vm2697_vm2, %v2696_v17  ;;  %2506 = vmatpush3.bf16.msra.mxu1 %v2600_v57 }
 0xb1b   : > { %v1585_v37 = vpack.c.bf16 %v1583_v56, %v1583_v56  ;;  %2507 = vmatprep.subr.bf16.mxu1 %v2696_v17 }
 0xb1d   : > { %2502 = vmatmul.mubr.msk.bf16.vlgmr.msra.gmra.mrb[36].mxu0 %vm795_vm3, %v1585_v37 }
 0xb1e   : > { %2517 = vmatprep.mubr.msk.bf16.mxu0 %vm2697_vm2, %v2696_v17  ;;  %2508 = vmatpush3.bf16.msra.mxu1 %v2601_v58  ;;  %v2318_v58 = vld [vmem:[%s3222_s17] ss:$0 sm:$0xff] }
 0xb1f   : > { %2521 = vmatprep.subr.bf16.mxu1 %v2696_v17  ;;  %2514 = vmatpush3.bf16.msra.mxu0 %v2602_v46 }
 0xb20   : > { %2515 = vmatprep.subr.bf16.mxu0 %v2696_v17 }
 0xb23   : > { %2516 = vmatpush3.bf16.msra.mxu0 %v2603_v40 }
 0xbec   : > { %v1628_v59 = vpop.f32.mrb[24].mxu1 }
 0xbed   : > { %v2497_v60 = vpop.f32.mrb[25].mxu1 }
 0xbee   : > { %v1631_v61 = vpop.f32.mrb[26].mxu1 }
 0xbef   : > { %v2498_v62 = vpop.f32.mrb[27].mxu1 }
 0xbf0   : > { %v1676_v63 = vpop.f32.mrb[36].mxu0  ;;  %v2319_v62 = vld [vmem:[%s649_s13] ss:$0 sm:$0xff] }
 0xbf1   : > { %v2593_v0 = vpack.i.bf16 %v1676_v63, %v1628_v59  ;;  %v2503_v1 = vpop.f32.mrb[37].mxu0 }
 0xbf2   : > { %v1679_v4 = vpop.f32.mrb[38].mxu0 }
 0xbf3   : > { %2594 = vrot.lane.b32.xlu0 %v2593_v0, %s2711_s26  ;;  %v2504_v5 = vpop.f32.mrb[39].mxu0 }
 0xbf4   : > { %v2610_v5 = vld [vmem:[%s2863_s27 + $0x30] sm:$0xff]  }
 0xc65   : > { %v2595_v12 = vpop.permute.xlu0 %2594 }
 0xc66   : > { %v2597_v15 = vunpack.i.h.bf16 %v2595_v12  ;;  %v2596_v16 = vunpack.i.l.bf16 %v2595_v12 }
 0xc68   : > { %v1713_v21 = vsel %vm1711_vm7, %v1710_v20, %v2597_v15  ;;  %v1712_v22 = vsel %vm1711_vm7, %v1709_v18, %v2596_v16 }
 0xc69   : > { %v1714_v25 = vpack.c.bf16 %v1713_v21, %v1712_v22 }
 0xc6b   : > { %2510 = vmatmul.mubr.msk.bf16.vlgmr.msra.gmra.mrb[28].mxu1 %vm680_vm1, %v1714_v25 }
 0xc6c   : > { %2537 = vmatprep.mubr.msk.bf16.mxu1 %vm2697_vm2, %v2696_v17  ;;  %2522 = vmatpush3.bf16.msra.mxu1 %v2604_v19 }
 0xc6d   : > { %2523 = vmatprep.subr.bf16.mxu1 %v2696_v17 }
 0xc70   : > { %2524 = vmatpush3.bf16.msra.mxu1 %v2605_v23 }
 0xc71   : > { %2525 = vmatprep.subr.bf16.mxu1 %v2696_v17 }
 0xc74   : > { %2526 = vmatpush3.bf16.msra.mxu1 %v2606_v24 }
 0xc75   : > { %2527 = vmatprep.subr.bf16.mxu1 %v2696_v17 }
 0xc78   : > { %2528 = vmatpush3.bf16.msra.mxu1 %v2607_v47  ;;  %v2334_v47 = vld [vmem:[%s3223_s16] ss:$0 sm:$0xff] (!%p2333_p5) }
 0xc79   : > { %2529 = vmatprep.subr.bf16.mxu1 %v2696_v17 }
 0xc7c   : > { %2530 = vmatpush3.bf16.msra.mxu1 %v2608_v48 }
 0xc7d   : > { %2531 = vmatprep.subr.bf16.mxu1 %v2696_v17 }
 0xc80   : > { %2532 = vmatpush3.bf16.msra.mxu1 %v2609_v50 }
 0xc81   : > { %2533 = vmatprep.subr.bf16.mxu1 %v2696_v17 }
 0xc84   : > { %2534 = vmatpush3.bf16.msra.mxu1 %v2610_v5 }
 0xc85   : > { %2535 = vmatprep.subr.bf16.mxu1 %v2696_v17  ;;  %v2324_v17 = vld [vmem:[%s665_s12] ss:$0 sm:$0xff] }
 0xc88   : > { %2536 = vmatpush3.bf16.msra.mxu1 %v2611_v6 }
 0xd3e   : > { %v1775_v26 = vpop.f32.mrb[28].mxu1 }
 0xd3f   : > { %v1776_v27 = vadd.f32 %v2314_v33, %v1775_v26  ;;  %v2511_v29 = vpop.f32.mrb[29].mxu1 }
 0xd40   : > { %v1778_v28 = vpop.f32.mrb[30].mxu1 }
 0xd41   : > { %v3082_v30 = vadd.f32 %v1776_v27, %v2872_v2  ;;  %v1779_v31 = vadd.f32 %v2314_v33, %v1778_v28  ;;  %v2512_v32 = vpop.f32.mrb[31].mxu1 }
 0xd43   : > { %v3085_v34 = vadd.f32 %v1779_v31, %v2874_v3  ;;  %v1786_v35 = vsel %vm680_vm1, %v3082_v30, 0.0 }
 0xd44   : > { %1787 = vadd.xlane.f32.xlu1 %v1786_v35 }
 0xd45   : > { %v1789_v36 = vsel %vm680_vm1, %v3085_v34, 0.0 }
 0xd46   : > { %1790 = vadd.xlane.f32.xlu0 %v1789_v36 }
 0xdd1   : > { %v1788_v38 = vpop.xlane.xlu1 %1787 }
 0xdd2   : > { %v1792_v49 = vmul.f32 0.03125, %v1788_v38 }
 0xdd3   : > { %v1791_v2 = vpop.xlane.xlu0 %1790 }
 0xdd4   : > { %v1794_v39 = vsub.f32 %v3082_v30, %v1792_v49  ;;  %v1793_v41 = vmul.f32 0.03125, %v1791_v2 }
 0xdd6   : > { %v1795_v3 = vsub.f32 %v3085_v34, %v1793_v41  ;;  %v1796_v42 = vmul.f32 %v1794_v39, %v1794_v39  ;;  %v2652_v41 = vld [vmem:[%s3200_s14] sm:$0xff] (!%p2333_p5)  }
 0xdd8   : > { %v1798_v43 = vsel %vm680_vm1, %v1796_v42, 0.0  ;;  %v1797_v44 = vmul.f32 %v1795_v3, %v1795_v3  ;;  %v2653_v42 = vld [vmem:[%s3200_s14 + $0x8] sm:$0xff] (!%p2333_p5)  }
 0xdd9   : > { %1799 = vadd.xlane.f32.xlu0 %v1798_v43 }
 0xdda   : > { %v1801_v45 = vsel %vm680_vm1, %v1797_v44, 0.0 }
 0xddd   : > { %1802 = vadd.xlane.f32.xlu0 %v1801_v45 }
 0xe66   : > { %v1800_v51 = vpop.xlane.xlu0 %1799 }
 0xe67   : > { %v1804_v52 = vmul.f32 0.03125, %v1800_v51 }
 0xe69   : > { %v1806_v53 = vadd.f32 1e-05, %v1804_v52  ;;  %v2335_v52 = vld [vmem:[%s3224_s18] ss:$0 sm:$0xff] (!%p2333_p5) }
 0xe6a   : > { %v1803_v54 = vpop.xlane.xlu0 %1802 }
 0xe6b   : > { %2648 = vrsqrt.f32 %v1806_v53  ;;  %v1805_v55 = vmul.f32 0.03125, %v1803_v54 }
 0xe6d   : > { %v1807_v56 = vadd.f32 1e-05, %v1805_v55 }
 0xe6f   : > { %2650 = vrsqrt.f32 %v1807_v56 }
 0xe75   : > { %v2649_v37 = vpop.eup %2648 }
 0xe76   : > { %v1810_v57 = vmul.f32 %v2649_v37, %v1794_v39  ;;  %v2336_v37 = vld [vmem:[%s3225_s4] ss:$0 sm:$0xff] (!%p2333_p5) }
 0xe78   : > { %v1818_v60 = vmul.f32 %v2318_v58, %v1810_v57 }
 0xe79   : > { %v2651_v59 = vpop.eup %2650 }
 0xe7a   : > { %v1811_v61 = vmul.f32 %v2651_v59, %v1795_v3  ;;  %v1826_v0 = vadd.f32 %v2319_v62, %v1818_v60  ;;  %v2712_v3 = vmov (!%p2333_p5), 0.0  }
 0xe7b   : > { %2541 = vmatprep.subr.bf16.mxu0 (!%p2333_p5), %v2712_v3 }
 0xe7c   : > { %v1819_v63 = vmul.f32 %v2318_v58, %v1811_v61 }
 0xe7e   : > { %v1827_v1 = vadd.f32 %v2319_v62, %v1819_v63 }
 0xe80   : > { %v1828_v4 = vpack.c.bf16 %v1827_v1, %v1826_v0 }
 0xe82   : > { %2518 = vmatmul.mubr.msk.bf16.vlgmr.msra.gmra.mrb[40].mxu0 %vm680_vm1, %v1828_v4 }
 0xe83   : > { %2545 = vmatprep.mubr.msk.bf16.mxu0 (!%p2333_p5), %vm2713_vm8, %v2712_v3  ;;  %2542 = vmatpush3.bf16.msra.mxu0 (!%p2333_p5), %v2652_v41 }
 0xe84   : > { %2543 = vmatprep.subr.bf16.mxu0 (!%p2333_p5), %v2712_v3 }
 0xe87   : > { %2544 = vmatpush3.bf16.msra.mxu0 (!%p2333_p5), %v2653_v42 }
 0xf55   : > { %v1889_v8 = vpop.f32.mrb[40].mxu0 }
 0xf56   : > { %v1890_v9 = vadd.f32 %v2320_v7, %v1889_v8  ;;  %v2519_v10 = vpop.f32.mrb[41].mxu0 }
 0xf57   : > { %v1892_v11 = vpop.f32.mrb[42].mxu0 }
 0xf58   : > { %v1893_v12 = vadd.f32 %v2320_v7, %v1892_v11  ;;  %v2520_v13 = vpop.f32.mrb[43].mxu0  ;;  %v1896_v14 = vmax.f32 %v1890_v9, 0.0 }
 0xf5a   : > { %v1897_v15 = vmax.f32 %v1893_v12, 0.0 }
 0xf5c   : > { %v1898_v16 = vpack.c.bf16 %v1897_v15, %v1896_v14 }
 0xf5e   : > { %2538 = vmatmul.mubr.bf16.vlgmr.msra.gmra.mrb[32].mxu1 %v1898_v16 }
0x1031   : > { %v2004_v18 = vpop.f32.mrb[32].mxu1 }
0x1032   : > { %v2005_v20 = vadd.f32 %v2324_v17, %v2004_v18  ;;  %v2539_v21 = vpop.f32.mrb[33].mxu1  ;;  %2018 = sbr.rel (%p2333_p5) target bundleno = 4686 (0x124e), region = 92 }
0x1033   : > { %v2007_v22 = vpop.f32.mrb[34].mxu1 }
0x1034   : > { %v2011_v25 = vadd.f32 %v2005_v20, %v3082_v30  ;;  %v2008_v33 = vadd.f32 %v2324_v17, %v2007_v22  ;;  %v2540_v26 = vpop.f32.mrb[35].mxu1 }
0x1036   : > { %2013 = vst.msk [vmem:[#allocation2] sm:$0xff] %vm680_vm1, %v2011_v25  ;;  %v2012_v27 = vadd.f32 %v2008_v33, %v3085_v34  ;;  %v2021_v29 = vsel (!%p2333_p5), %vm680_vm1, %v2011_v25, 0.0 }
0x1037   : > { %2022 = vadd.xlane.f32.xlu0 (!%p2333_p5), %v2021_v29 }
0x1038   : > { %2014 = vst.msk [vmem:[#allocation2 + $0x8] sm:$0xff] %vm680_vm1, %v2012_v27  ;;  %v2024_v28 = vsel (!%p2333_p5), %vm680_vm1, %v2012_v27, 0.0 }
0x103b   : > { %2025 = vadd.xlane.f32.xlu0 %v2024_v28 }
0x10c4   : > { %v2023_v31 = vpop.xlane.xlu0 %2022 }
0x10c5   : > { %v2027_v32 = vmul.f32 0.03125, %v2023_v31 }
0x10c7   : > { %v2029_v30 = vsub.f32 %v2011_v25, %v2027_v32 }
0x10c8   : > { %v2026_v35 = vpop.xlane.xlu0 %2025 }
0x10c9   : > { %v2028_v36 = vmul.f32 0.03125, %v2026_v35  ;;  %v2031_v38 = vmul.f32 %v2029_v30, %v2029_v30 }
0x10cb   : > { %v2030_v49 = vsub.f32 %v2012_v27, %v2028_v36  ;;  %v2033_v34 = vsel %vm680_vm1, %v2031_v38, 0.0 }
0x10cc   : > { %2034 = vadd.xlane.f32.xlu1 %v2033_v34 }
0x10cd   : > { %v2032_v2 = vmul.f32 %v2030_v49, %v2030_v49 }
0x10cf   : > { %v2036_v39 = vsel %vm680_vm1, %v2032_v2, 0.0 }
0x10d0   : > { %2037 = vadd.xlane.f32.xlu1 %v2036_v39 }
0x1159   : > { %v2035_v43 = vpop.xlane.xlu1 %2034 }
0x115a   : > { %v2039_v44 = vmul.f32 0.03125, %v2035_v43 }
0x115c   : > { %v2041_v45 = vadd.f32 1e-05, %v2039_v44 }
0x115d   : > { %v2038_v46 = vpop.xlane.xlu1 %2037 }
0x115e   : > { %2654 = vrsqrt.f32 %v2041_v45  ;;  %v2040_v40 = vmul.f32 0.03125, %v2038_v46 }
0x1160   : > { %v2042_v19 = vadd.f32 1e-05, %v2040_v40 }
0x1162   : > { %2656 = vrsqrt.f32 %v2042_v19 }
0x1168   : > { %v2655_v23 = vpop.eup %2654 }
0x1169   : > { %v2045_v24 = vmul.f32 %v2655_v23, %v2029_v30 }
0x116b   : > { %v2053_v51 = vmul.f32 %v2334_v47, %v2045_v24 }
0x116c   : > { %v2657_v48 = vpop.eup %2656 }
0x116d   : > { %v2046_v50 = vmul.f32 %v2657_v48, %v2030_v49  ;;  %v2061_v54 = vadd.f32 %v2335_v52, %v2053_v51 }
0x116f   : > { %v2054_v53 = vmul.f32 %v2334_v47, %v2046_v50 }
0x1171   : > { %v2062_v55 = vadd.f32 %v2335_v52, %v2054_v53 }
0x1173   : > { %v2063_v56 = vpack.c.bf16 %v2062_v55, %v2061_v54 }
0x1175   : > { %2546 = vmatmul.mubr.msk.bf16.vlgmr.msra.gmra.mrb[0].mxu0 %vm680_vm1, %v2063_v56 }
0x1248   : > { %v2124_v57 = vpop.f32.mrb[0].mxu0 }
0x1249   : > { %v2125_v58 = vadd.f32 %v2336_v37, %v2124_v57  ;;  %v2547_v59 = vpop.f32.mrb[1].mxu0 }
0x124a   : > { %v2127_v60 = vpop.f32.mrb[2].mxu0 }
0x124b   : > { %2131 = vst [vmem:[#allocation3] sm:$0xff] %v2125_v58  ;;  %v2128_v61 = vadd.f32 %v2336_v37, %v2127_v60  ;;  %v2548_v62 = vpop.f32.mrb[3].mxu0 }
0x124d   : > { %2132 = vst [vmem:[#allocation3 + $0x8] sm:$0xff] %v2128_v61 }
0x124e PF: > { %p2553_p6 = scmp.eq.s32.totalorder %s2807_s22, 1  ;;  %s2714_s24 = smov [#allocation3]  }
0x124f   : > { %s2139_s19 = sshll.u32 %s2714_s24, 4  ;;  %s2140_s19 = int_to_ptr.vmem [resolvable:$true] %s2139_s19 }
0x1250   : > { %s2658_s20 = scalar_lea.vmem %s2140_s19, 256  ;;  %p2665_p10 = scmp.lt.s32.totalorder %s2140_s19, %s2140_s19 }
0x1251   : > { %p2659_p7 = scmp.ne.s32.totalorder %s2140_s19, %s2658_s20  ;;  %p2666_p11 = scmp.lt.s32.totalorder %s2658_s20, %s2658_s20 }
0x1253   : > { %p2660_p8 = pnand %p2659_p7, %p2553_p6  ;;  %p2667_p12 = por %p2666_p11, %p2665_p10 }
0x1255   : > { %p2661_p9 = pneg %p2660_p8 }
0x1257   : > { %p2668_p13 = pnand %p2667_p12, %p2661_p9 }
0x1259   : > { %2671 = shalt.err (!%p2668_p13)
}
0x125a   : > { %s3226_s3 = sld [smem:[#allocation13_spill]] }
0x1260   : > { %s2672_s12 = scalar_lea.hbm %s3226_s3, 256 }
0x1261   : > { %p2673_p0 = scmp.ne.s32.totalorder %s3226_s3, %s2672_s12  ;;  %p2678_p3 = scmp.lt.u32.totalorder %s2672_s12, %s3226_s3 }
0x1263   : > { %p2674_p1 = pnand %p2673_p0, %p2553_p6 }
0x1265   : > { %p2675_p2 = pneg %p2674_p1 }
0x1267   : > { %p2680_p4 = pnand %p2678_p3, %p2675_p2 }
0x1269   : > { %2683 = shalt.err (!%p2680_p4)
}
0x126a   : > { %s2715_s16 = smov 128  }
0x126b   : > { %2550 = dma.vmem_to_hbm [thread:$0]  (%p2553_p6), %s2140_s19, 256, %s3226_s3, [#allocation4], %s2715_s16, %s2715_s16, %s2709_s25  }
0x126c   : > { %2689 = dma.done.wait (%p2553_p6), [#allocation4], 256  }
0x126d   : > { %2691 = vsyncadd (%p2553_p6), [#allocation4], 4294967040 }
0x126e PF: > { %s3227_s18 = sld [smem:[#allocation6_spill]] }
0x1274   : > { %s27_s21 = sadd.s32 1, %s3227_s18  }
0x1275   : > { %p24_p5 = scmp.ge.s32.totalorder %s27_s21, 4  }
0x1277   :  { %26 = sbr.rel (!%p24_p5) target bundleno = 9 (0x9), region = 149 }
0x127e   :  { %2155 = vsyncpa [#allocation4], 1 }
0x127f   :  { %2157 = vsyncpa [#allocation4 + $0x1], 1 }

</bundles_post_ra>
